<compile_context>
chip_gen: v7x
topology: tpu7x:2x2x1
jax: 0.10.0
libtpu: 0.0.40
codegen_flags: <defaults>
</compile_context>

<pallas_src>
import functools

import jax
import jax.numpy as jnp
from jax.experimental import pallas as pl
from jax.experimental.pallas import tpu as pltpu


def _temporal_gnn_kernel(x_ref, a_ref,
                         wc_ref, bc_ref,
                         wz_ref, bz_ref,
                         wh_ref, bh_ref,
                         wlin_ref, blin_ref,
                         probs_ref,
                         o_ref, *, bb, periods):
    """One grid step = `bb` batch elements; all periods handled by batched matmuls."""
    n = a_ref.shape[0]
    f = wc_ref.shape[0]
    hidden = wz_ref.shape[1]
    q = bb * periods                       # number of (batch, period) column groups

    xb = x_ref[0]                          # (N, bb*P*F), cols ordered (batch, period, feat)
    a = a_ref[...]                         # (N, N)  D^-1/2 (A + 2I) D^-1/2

    # (1) One graph aggregation for every batch & period:  (N, N) @ (N, bb*P*F).
    agg = jnp.dot(a, xb, preferred_element_type=jnp.float32)          # (N, bb*P*F)

    # (2) Relayout rows -> (batch, period, node), cols -> feature.  Static lane slices
    #     of width F + axis-0 concat (avoids an unsupported lane-splitting reshape).
    agg_r = jnp.concatenate(
        [agg[:, i * f:(i + 1) * f] for i in range(q)], axis=0)        # (bb*P*N, F)

    # (3) Fused conv feature transform:  (M, F) @ (F, 2H) + [bcz | bch].
    c = jnp.dot(agg_r, wc_ref[...],
                preferred_element_type=jnp.float32) + bc_ref[...]     # (M, 2H)

    # (4) Gates.  Weights are zero-padded to (2H, H): wz picks the Cz half, wh the Ch
    #     half, so no lane-32 slicing of c is needed.
    z = jax.nn.sigmoid(jnp.dot(c, wz_ref[...],
                               preferred_element_type=jnp.float32) + bz_ref[...])
    h_t = jnp.tanh(jnp.dot(c, wh_ref[...],
                           preferred_element_type=jnp.float32) + bh_ref[...])

    # (5) Attention-weighted sum over periods (H0 = 0  =>  H = sum_p probs_p*(1-Z_p)*Ht_p).
    contrib = ((1.0 - z) * h_t).reshape(q, n, hidden)                  # (bb*P, N, H)
    pr = probs_ref[...]                                                # (P, N, H)
    hs = [jnp.sum(contrib[b * periods:(b + 1) * periods] * pr, axis=0)
          for b in range(bb)]                                          # bb x (N, H)
    h = jnp.concatenate(hs, axis=0) if bb > 1 else hs[0]               # (bb*N, H), rows (b, n)

    # (6) Head: relu + linear.  Rows are already batch-major -> direct store.
    h = jnp.maximum(h, 0.0)
    out = jnp.dot(h, wlin_ref[...],
                  preferred_element_type=jnp.float32) + blin_ref[...]  # (bb*N, PF)
    o_ref[0] = out.astype(o_ref.dtype)


def _default_fold_batch():
    """Fold B into the matmul M dim on single-TensorCore chips; keep grid=(B,) on v7x."""
    try:
        kind = (jax.devices()[0].device_kind or "").lower()
    except Exception:
        return True
    return "v7" not in kind


def temporal_gnn_forward(x, a_hat, params, *, fold_batch=None):
    """x: (B, N, F, P) float32.  Returns out with shape == x.shape (float32)."""
    B, N, F, P = x.shape
    Hd = params["Wcz"].shape[1]
    PF = params["Wlin"].shape[1]

    if fold_batch is None:
        fold_batch = _default_fold_batch()
    if B == 1:
        fold_batch = True
    bb = B if fold_batch else 1
    G = B // bb

    # Input layout: rows = nodes (aggregation contraction dim),
    #               cols = (batch, period, feature) with feature fastest.
    if fold_batch:
        x_arr = jnp.transpose(x, (1, 0, 3, 2)).reshape(1, N, B * P * F)
    else:
        x_arr = jnp.transpose(x, (0, 1, 3, 2)).reshape(B, N, P * F)
    x_arr = x_arr.astype(jnp.float32)

    # Fused conv weight/bias: [Wcz | Wch] and [bcz | bch].
    wc = jnp.concatenate([params["Wcz"], params["Wch"]], axis=1)       # (F, 2H)
    bc = jnp.concatenate([params["bcz"], params["bch"]], axis=1)       # (1, 2H)

    # Zero-padded gate weights: wz acts only on the Cz half, wh only on the Ch half.
    zeros = jnp.zeros((Hd, Hd), jnp.float32)
    wz = jnp.concatenate([params["Wlz"], zeros], axis=0)               # (2H, H)
    wh = jnp.concatenate([zeros, params["Wlh"]], axis=0)               # (2H, H)
    bz, bh = params["blz"], params["blh"]                              # (1, H) each

    wlin, blin = params["Wlin"], params["blin"]                        # (H, PF), (1, PF)

    # Attention probs pre-broadcast to (P, N, H): dense in-kernel VPU multiply.
    probs_b = jnp.broadcast_to(params["probs"][:, None, None],
                               (P, N, Hd)).astype(jnp.float32)

    kernel = functools.partial(_temporal_gnn_kernel, bb=bb, periods=P)

    def const(shape):
        nd = len(shape)
        return pl.BlockSpec(shape, lambda g, _nd=nd: (0,) * _nd)

    out = pl.pallas_call(
        kernel,
        out_shape=jax.ShapeDtypeStruct((G, bb * N, PF), jnp.float32),
        grid_spec=pltpu.PrefetchScalarGridSpec(
            num_scalar_prefetch=0,
            grid=(G,),
            in_specs=[
                pl.BlockSpec((1, N, bb * P * F), lambda g: (g, 0, 0)),  # x, per grid step
                const((N, N)),                                          # A_hat
                const((F, 2 * Hd)), const((1, 2 * Hd)),                 # fused conv W / b
                const((2 * Hd, Hd)), const((1, Hd)),                    # z-gate W / b
                const((2 * Hd, Hd)), const((1, Hd)),                    # h-gate W / b
                const((Hd, PF)), const((1, PF)),                        # output linear
                const((P, N, Hd)),                                      # attention probs
            ],
            out_specs=pl.BlockSpec((1, bb * N, PF), lambda g: (g, 0, 0)),
        ),
        compiler_params=pltpu.CompilerParams(
            dimension_semantics=("parallel",),   # 1 step (folded) or one batch per core
        ),
    )(x_arr, a_hat.astype(jnp.float32), wc, bc, wz, bz, wh, bh, wlin, blin, probs_b)

    # Rows are (batch, node); columns are the head's P*F outputs -> out.view(x.shape).
    # TODO(synk): if real PyTorch weights are imported, verify Wlin's column ordering
    # matches this (feature-major, period-minor) reshape.
    return out.reshape(x.shape)


def make_gcn_norm_adj(edge_index, num_nodes):
    """Dense D^-1/2 (A + 2I) D^-1/2 (GCNConv with improved=True, add_self_loops=True)."""
    A = jnp.zeros((num_nodes, num_nodes), jnp.float32)
    A = A.at[edge_index[1], edge_index[0]].set(1.0)        # message src -> dst
    A = A + 2.0 * jnp.eye(num_nodes, dtype=jnp.float32)    # improved: self-loop fill 2
    deg = A.sum(axis=1)
    dinv = 1.0 / jnp.sqrt(deg)
    return dinv[:, None] * A * dinv[None, :]


def init_params(key, node_features, hidden_dim, num_outputs, periods):
    ks = jax.random.split(key, 12)
    u = lambda k, shape, s=0.2: jax.random.uniform(k, shape, jnp.float32, -s, s)
    attention = u(ks[0], (periods,), 1.0)
    return dict(
        Wcz=u(ks[1], (node_features, hidden_dim)),   bcz=u(ks[2], (1, hidden_dim)),
        Wch=u(ks[3], (node_features, hidden_dim)),   bch=u(ks[4], (1, hidden_dim)),
        Wlz=u(ks[5], (hidden_dim, hidden_dim)),      blz=u(ks[6], (1, hidden_dim)),
        Wlh=u(ks[7], (hidden_dim, hidden_dim)),      blh=u(ks[8], (1, hidden_dim)),
        Wlin=u(ks[9], (hidden_dim, periods * num_outputs)),
        blin=u(ks[10], (1, periods * num_outputs)),
        probs=jax.nn.softmax(attention),
    )


def reference_forward(x, a_hat, params):
    """Pure-JAX f32 reference for validation."""
    B, N, F, P = x.shape
    h_acc = jnp.zeros((B, N, params["Wcz"].shape[1]), jnp.float32)
    for t in range(P):
        xt = x[:, :, :, t]
        cz = jnp.einsum("ij,bjh->bih", a_hat, xt @ params["Wcz"]) + params["bcz"]
        ch = jnp.einsum("ij,bjh->bih", a_hat, xt @ params["Wch"]) + params["bch"]
        z = jax.nn.sigmoid(cz @ params["Wlz"] + params["blz"])
        ht = jnp.tanh(ch @ params["Wlh"] + params["blh"])
        h_acc = h_acc + params["probs"][t] * (1.0 - z) * ht
    h = jnp.maximum(h_acc, 0.0)
    out = h @ params["Wlin"] + params["blin"]
    return out.reshape(x.shape)


if __name__ == "__main__":
    # Small shapes implied by the module: num_outputs must equal node_features
    # for out.view(x.shape) to be valid.
    B, N, F, P, Hd = 2, 16, 4, 8, 32          # batch, nodes, node_features, periods, hidden
    num_outputs = F

    key = jax.random.PRNGKey(0)
    kx, kp = jax.random.split(key)
    x = jax.random.normal(kx, (B, N, F, P), jnp.float32)

    # Deterministic bidirectional ring graph as edge_index.
    src = jnp.arange(N, dtype=jnp.int32)
    dst = (src + 1) % N
    edge_index = jnp.stack([jnp.concatenate([src, dst]),
                            jnp.concatenate([dst, src])])      # (2, 2N)
    a_hat = make_gcn_norm_adj(edge_index, N)

    params = init_params(kp, F, Hd, num_outputs, P)
    ref = reference_forward(x, a_hat, params)

    # Auto path (fold batch on single-TC chips, grid=(B,) parallel on multi-TC chips).
    out = temporal_gnn_forward(x, a_hat, params)
    out = jax.block_until_ready(out)
    assert out.shape == x.shape
    assert jnp.allclose(out, ref, rtol=1e-3, atol=1e-3)

    # Explicitly exercise both grid configurations.
    for fold in (True, False):
        out_f = temporal_gnn_forward(x, a_hat, params, fold_batch=fold)
        out_f = jax.block_until_ready(out_f)
        assert out_f.shape == x.shape
        assert jnp.allclose(out_f, ref, rtol=1e-3, atol=1e-3), f"mismatch fold={fold}"

    print("KERNEL_OK")
</pallas_src>

<mosaic_0001>
module attributes {stable_mosaic.version = 11 : i64} {
  func.func @_temporal_gnn_kernel(%arg0: i32, %arg1: memref<1x16x64xf32, #tpu.memory_space<vmem>>, %arg2: memref<16x16xf32, #tpu.memory_space<vmem>>, %arg3: memref<4x64xf32, #tpu.memory_space<vmem>>, %arg4: memref<1x64xf32, #tpu.memory_space<vmem>>, %arg5: memref<64x32xf32, #tpu.memory_space<vmem>>, %arg6: memref<1x32xf32, #tpu.memory_space<vmem>>, %arg7: memref<64x32xf32, #tpu.memory_space<vmem>>, %arg8: memref<1x32xf32, #tpu.memory_space<vmem>>, %arg9: memref<32x32xf32, #tpu.memory_space<vmem>>, %arg10: memref<1x32xf32, #tpu.memory_space<vmem>>, %arg11: memref<8x16x32xf32, #tpu.memory_space<vmem>>, %arg12: memref<1x32x32xf32, #tpu.memory_space<vmem>>) attributes {dimension_semantics = [#tpu.dimension_semantics<parallel>], iteration_bounds = array<i64: 1>, scalar_prefetch = 0 : i64, scratch_operands = 0 : i64, tpu.core_type = #tpu.core_type<tc>, window_params = [{transform_indices = @transform_0, window_bounds = array<i64: 1, 16, 64>}, {pipeline_mode = #tpu.pipeline_mode<synchronous>, transform_indices = @transform_1, window_bounds = array<i64: 16, 16>}, {pipeline_mode = #tpu.pipeline_mode<synchronous>, transform_indices = @transform_2, window_bounds = array<i64: 4, 64>}, {pipeline_mode = #tpu.pipeline_mode<synchronous>, transform_indices = @transform_3, window_bounds = array<i64: 1, 64>}, {pipeline_mode = #tpu.pipeline_mode<synchronous>, transform_indices = @transform_4, window_bounds = array<i64: 64, 32>}, {pipeline_mode = #tpu.pipeline_mode<synchronous>, transform_indices = @transform_5, window_bounds = array<i64: 1, 32>}, {pipeline_mode = #tpu.pipeline_mode<synchronous>, transform_indices = @transform_6, window_bounds = array<i64: 64, 32>}, {pipeline_mode = #tpu.pipeline_mode<synchronous>, transform_indices = @transform_7, window_bounds = array<i64: 1, 32>}, {pipeline_mode = #tpu.pipeline_mode<synchronous>, transform_indices = @transform_8, window_bounds = array<i64: 32, 32>}, {pipeline_mode = #tpu.pipeline_mode<synchronous>, transform_indices = @transform_9, window_bounds = array<i64: 1, 32>}, {pipeline_mode = #tpu.pipeline_mode<synchronous>, transform_indices = @transform_10, window_bounds = array<i64: 8, 16, 32>}, {transform_indices = @transform_11, window_bounds = array<i64: 1, 32, 32>}]} {
    %c0 = arith.constant 0 : index
    %c0_0 = arith.constant 0 : index
    %c0_1 = arith.constant 0 : index
    %0 = vector.load %arg1[%c0, %c0_0, %c0_1] : memref<1x16x64xf32, #tpu.memory_space<vmem>>, vector<1x16x64xf32>
    %1 = vector.shape_cast %0 : vector<1x16x64xf32> to vector<16x64xf32>
    %c0_2 = arith.constant 0 : index
    %c0_3 = arith.constant 0 : index
    %2 = vector.load %arg2[%c0_2, %c0_3] : memref<16x16xf32, #tpu.memory_space<vmem>>, vector<16x16xf32>
    %cst = arith.constant dense<0.000000e+00> : vector<16x64xf32>
    %3 = tpu.matmul %2, %1, %cst {dimension_numbers = #tpu.dot_dimension_numbers<[1], [0], [0], [1], [0, 0, 1, 1], [], []>} : vector<16x16xf32>, vector<16x64xf32>, vector<16x64xf32> -> vector<16x64xf32>
    %4 = vector.extract_strided_slice %3 {offsets = [0, 0], sizes = [16, 4], strides = [1, 1]} : vector<16x64xf32> to vector<16x4xf32>
    %5 = vector.extract_strided_slice %3 {offsets = [0, 4], sizes = [16, 4], strides = [1, 1]} : vector<16x64xf32> to vector<16x4xf32>
    %6 = vector.extract_strided_slice %3 {offsets = [0, 8], sizes = [16, 4], strides = [1, 1]} : vector<16x64xf32> to vector<16x4xf32>
    %7 = vector.extract_strided_slice %3 {offsets = [0, 12], sizes = [16, 4], strides = [1, 1]} : vector<16x64xf32> to vector<16x4xf32>
    %8 = vector.extract_strided_slice %3 {offsets = [0, 16], sizes = [16, 4], strides = [1, 1]} : vector<16x64xf32> to vector<16x4xf32>
    %9 = vector.extract_strided_slice %3 {offsets = [0, 20], sizes = [16, 4], strides = [1, 1]} : vector<16x64xf32> to vector<16x4xf32>
    %10 = vector.extract_strided_slice %3 {offsets = [0, 24], sizes = [16, 4], strides = [1, 1]} : vector<16x64xf32> to vector<16x4xf32>
    %11 = vector.extract_strided_slice %3 {offsets = [0, 28], sizes = [16, 4], strides = [1, 1]} : vector<16x64xf32> to vector<16x4xf32>
    %12 = vector.extract_strided_slice %3 {offsets = [0, 32], sizes = [16, 4], strides = [1, 1]} : vector<16x64xf32> to vector<16x4xf32>
    %13 = vector.extract_strided_slice %3 {offsets = [0, 36], sizes = [16, 4], strides = [1, 1]} : vector<16x64xf32> to vector<16x4xf32>
    %14 = vector.extract_strided_slice %3 {offsets = [0, 40], sizes = [16, 4], strides = [1, 1]} : vector<16x64xf32> to vector<16x4xf32>
    %15 = vector.extract_strided_slice %3 {offsets = [0, 44], sizes = [16, 4], strides = [1, 1]} : vector<16x64xf32> to vector<16x4xf32>
    %16 = vector.extract_strided_slice %3 {offsets = [0, 48], sizes = [16, 4], strides = [1, 1]} : vector<16x64xf32> to vector<16x4xf32>
    %17 = vector.extract_strided_slice %3 {offsets = [0, 52], sizes = [16, 4], strides = [1, 1]} : vector<16x64xf32> to vector<16x4xf32>
    %18 = vector.extract_strided_slice %3 {offsets = [0, 56], sizes = [16, 4], strides = [1, 1]} : vector<16x64xf32> to vector<16x4xf32>
    %19 = vector.extract_strided_slice %3 {offsets = [0, 60], sizes = [16, 4], strides = [1, 1]} : vector<16x64xf32> to vector<16x4xf32>
    %20 = tpu.concatenate %4, %5, %6, %7, %8, %9, %10, %11, %12, %13, %14, %15, %16, %17, %18, %19 in 0 : vector<16x4xf32>, vector<16x4xf32>, vector<16x4xf32>, vector<16x4xf32>, vector<16x4xf32>, vector<16x4xf32>, vector<16x4xf32>, vector<16x4xf32>, vector<16x4xf32>, vector<16x4xf32>, vector<16x4xf32>, vector<16x4xf32>, vector<16x4xf32>, vector<16x4xf32>, vector<16x4xf32>, vector<16x4xf32> -> vector<256x4xf32>
    %c0_4 = arith.constant 0 : index
    %c0_5 = arith.constant 0 : index
    %21 = vector.load %arg3[%c0_4, %c0_5] : memref<4x64xf32, #tpu.memory_space<vmem>>, vector<4x64xf32>
    %cst_6 = arith.constant dense<0.000000e+00> : vector<256x64xf32>
    %22 = tpu.matmul %20, %21, %cst_6 {dimension_numbers = #tpu.dot_dimension_numbers<[1], [0], [0], [1], [0, 0, 1, 1], [], []>} : vector<256x4xf32>, vector<4x64xf32>, vector<256x64xf32> -> vector<256x64xf32>
    %c0_7 = arith.constant 0 : index
    %c0_8 = arith.constant 0 : index
    %23 = vector.load %arg4[%c0_7, %c0_8] : memref<1x64xf32, #tpu.memory_space<vmem>>, vector<1x64xf32>
    %24 = vector.broadcast %23 : vector<1x64xf32> to vector<256x64xf32>
    %25 = arith.addf %22, %24 : vector<256x64xf32>
    %c0_9 = arith.constant 0 : index
    %c0_10 = arith.constant 0 : index
    %26 = vector.load %arg5[%c0_9, %c0_10] : memref<64x32xf32, #tpu.memory_space<vmem>>, vector<64x32xf32>
    %cst_11 = arith.constant dense<0.000000e+00> : vector<256x32xf32>
    %27 = tpu.matmul %25, %26, %cst_11 {dimension_numbers = #tpu.dot_dimension_numbers<[1], [0], [0], [1], [0, 0, 1, 1], [], []>} : vector<256x64xf32>, vector<64x32xf32>, vector<256x32xf32> -> vector<256x32xf32>
    %c0_12 = arith.constant 0 : index
    %c0_13 = arith.constant 0 : index
    %28 = vector.load %arg6[%c0_12, %c0_13] : memref<1x32xf32, #tpu.memory_space<vmem>>, vector<1x32xf32>
    %29 = vector.broadcast %28 : vector<1x32xf32> to vector<256x32xf32>
    %30 = arith.addf %27, %29 : vector<256x32xf32>
    %31 = arith.negf %30 : vector<256x32xf32>
    %32 = math.exp %31 : vector<256x32xf32>
    %cst_14 = arith.constant 1.000000e+00 : f32
    %33 = vector.broadcast %cst_14 : f32 to vector<256x32xf32>
    %34 = arith.addf %33, %32 : vector<256x32xf32>
    %35 = arith.divf %33, %34 : vector<256x32xf32>
    %c0_15 = arith.constant 0 : index
    %c0_16 = arith.constant 0 : index
    %36 = vector.load %arg7[%c0_15, %c0_16] : memref<64x32xf32, #tpu.memory_space<vmem>>, vector<64x32xf32>
    %cst_17 = arith.constant dense<0.000000e+00> : vector<256x32xf32>
    %37 = tpu.matmul %25, %36, %cst_17 {dimension_numbers = #tpu.dot_dimension_numbers<[1], [0], [0], [1], [0, 0, 1, 1], [], []>} : vector<256x64xf32>, vector<64x32xf32>, vector<256x32xf32> -> vector<256x32xf32>
    %c0_18 = arith.constant 0 : index
    %c0_19 = arith.constant 0 : index
    %38 = vector.load %arg8[%c0_18, %c0_19] : memref<1x32xf32, #tpu.memory_space<vmem>>, vector<1x32xf32>
    %39 = vector.broadcast %38 : vector<1x32xf32> to vector<256x32xf32>
    %40 = arith.addf %37, %39 : vector<256x32xf32>
    %41 = math.tanh %40 : vector<256x32xf32>
    %cst_20 = arith.constant 1.000000e+00 : f32
    %42 = vector.broadcast %cst_20 : f32 to vector<256x32xf32>
    %43 = arith.subf %42, %35 : vector<256x32xf32>
    %44 = arith.mulf %43, %41 : vector<256x32xf32>
    %45 = vector.shape_cast %44 : vector<256x32xf32> to vector<16x16x32xf32>
    %c0_21 = arith.constant 0 : index
    %c0_22 = arith.constant 0 : index
    %c0_23 = arith.constant 0 : index
    %46 = vector.load %arg11[%c0_21, %c0_22, %c0_23] : memref<8x16x32xf32, #tpu.memory_space<vmem>>, vector<8x16x32xf32>
    %47 = vector.extract_strided_slice %45 {offsets = [0, 0, 0], sizes = [8, 16, 32], strides = [1, 1, 1]} : vector<16x16x32xf32> to vector<8x16x32xf32>
    %48 = arith.mulf %47, %46 : vector<8x16x32xf32>
    %cst_24 = arith.constant dense<0.000000e+00> : vector<16x32xf32>
    %49 = vector.multi_reduction <add>, %48, %cst_24 [0] : vector<8x16x32xf32> to vector<16x32xf32>
    %50 = vector.extract_strided_slice %45 {offsets = [8, 0, 0], sizes = [8, 16, 32], strides = [1, 1, 1]} : vector<16x16x32xf32> to vector<8x16x32xf32>
    %51 = arith.mulf %50, %46 : vector<8x16x32xf32>
    %cst_25 = arith.constant dense<0.000000e+00> : vector<16x32xf32>
    %52 = vector.multi_reduction <add>, %51, %cst_25 [0] : vector<8x16x32xf32> to vector<16x32xf32>
    %53 = tpu.concatenate %49, %52 in 0 : vector<16x32xf32>, vector<16x32xf32> -> vector<32x32xf32>
    %cst_26 = arith.constant 0.000000e+00 : f32
    %54 = vector.broadcast %cst_26 : f32 to vector<32x32xf32>
    %55 = arith.maximumf %53, %54 : vector<32x32xf32>
    %c0_27 = arith.constant 0 : index
    %c0_28 = arith.constant 0 : index
    %56 = vector.load %arg9[%c0_27, %c0_28] : memref<32x32xf32, #tpu.memory_space<vmem>>, vector<32x32xf32>
    %cst_29 = arith.constant dense<0.000000e+00> : vector<32x32xf32>
    %57 = tpu.matmul %55, %56, %cst_29 {dimension_numbers = #tpu.dot_dimension_numbers<[1], [0], [0], [1], [0, 0, 1, 1], [], []>} : vector<32x32xf32>, vector<32x32xf32>, vector<32x32xf32> -> vector<32x32xf32>
    %c0_30 = arith.constant 0 : index
    %c0_31 = arith.constant 0 : index
    %58 = vector.load %arg10[%c0_30, %c0_31] : memref<1x32xf32, #tpu.memory_space<vmem>>, vector<1x32xf32>
    %59 = vector.broadcast %58 : vector<1x32xf32> to vector<32x32xf32>
    %60 = arith.addf %57, %59 : vector<32x32xf32>
    %c0_32 = arith.constant 0 : index
    %c0_33 = arith.constant 0 : index
    %c0_34 = arith.constant 0 : index
    %61 = vector.load %arg12[%c0_32, %c0_33, %c0_34] : memref<1x32x32xf32, #tpu.memory_space<vmem>>, vector<1x32x32xf32>
    %62 = vector.shape_cast %61 : vector<1x32x32xf32> to vector<32x32xf32>
    %63 = vector.shape_cast %60 : vector<32x32xf32> to vector<1x32x32xf32>
    tpu.vector_store %arg12[%c0_32, %c0_33, %c0_34], %63 {strides = array<i32>} : memref<1x32x32xf32, #tpu.memory_space<vmem>>, vector<1x32x32xf32>,
    return
  }
  func.func @transform_0(%arg0: i32) -> (i32, i32, i32) {
    %c0_i32 = arith.constant 0 : i32
    %c0_i32_0 = arith.constant 0 : i32
    %c0_i32_1 = arith.constant 0 : i32
    return %arg0, %c0_i32, %c0_i32_0 : i32, i32, i32
  }
  func.func @transform_1(%arg0: i32) -> (i32, i32) {
    %c0_i32 = arith.constant 0 : i32
    %c0_i32_0 = arith.constant 0 : i32
    %c0_i32_1 = arith.constant 0 : i32
    return %c0_i32, %c0_i32_0 : i32, i32
  }
  func.func @transform_2(%arg0: i32) -> (i32, i32) {
    %c0_i32 = arith.constant 0 : i32
    %c0_i32_0 = arith.constant 0 : i32
    %c0_i32_1 = arith.constant 0 : i32
    return %c0_i32, %c0_i32_0 : i32, i32
  }
  func.func @transform_3(%arg0: i32) -> (i32, i32) {
    %c0_i32 = arith.constant 0 : i32
    %c0_i32_0 = arith.constant 0 : i32
    %c0_i32_1 = arith.constant 0 : i32
    return %c0_i32, %c0_i32_0 : i32, i32
  }
  func.func @transform_4(%arg0: i32) -> (i32, i32) {
    %c0_i32 = arith.constant 0 : i32
    %c0_i32_0 = arith.constant 0 : i32
    %c0_i32_1 = arith.constant 0 : i32
    return %c0_i32, %c0_i32_0 : i32, i32
  }
  func.func @transform_5(%arg0: i32) -> (i32, i32) {
    %c0_i32 = arith.constant 0 : i32
    %c0_i32_0 = arith.constant 0 : i32
    %c0_i32_1 = arith.constant 0 : i32
    return %c0_i32, %c0_i32_0 : i32, i32
  }
  func.func @transform_6(%arg0: i32) -> (i32, i32) {
    %c0_i32 = arith.constant 0 : i32
    %c0_i32_0 = arith.constant 0 : i32
    %c0_i32_1 = arith.constant 0 : i32
    return %c0_i32, %c0_i32_0 : i32, i32
  }
  func.func @transform_7(%arg0: i32) -> (i32, i32) {
    %c0_i32 = arith.constant 0 : i32
    %c0_i32_0 = arith.constant 0 : i32
    %c0_i32_1 = arith.constant 0 : i32
    return %c0_i32, %c0_i32_0 : i32, i32
  }
  func.func @transform_8(%arg0: i32) -> (i32, i32) {
    %c0_i32 = arith.constant 0 : i32
    %c0_i32_0 = arith.constant 0 : i32
    %c0_i32_1 = arith.constant 0 : i32
    return %c0_i32, %c0_i32_0 : i32, i32
  }
  func.func @transform_9(%arg0: i32) -> (i32, i32) {
    %c0_i32 = arith.constant 0 : i32
    %c0_i32_0 = arith.constant 0 : i32
    %c0_i32_1 = arith.constant 0 : i32
    return %c0_i32, %c0_i32_0 : i32, i32
  }
  func.func @transform_10(%arg0: i32) -> (i32, i32, i32) {
    %c0_i32 = arith.constant 0 : i32
    %c0_i32_0 = arith.constant 0 : i32
    %c0_i32_1 = arith.constant 0 : i32
    %c0_i32_2 = arith.constant 0 : i32
    return %c0_i32, %c0_i32_0, %c0_i32_1 : i32, i32, i32
  }
  func.func @transform_11(%arg0: i32) -> (i32, i32, i32) {
    %c0_i32 = arith.constant 0 : i32
    %c0_i32_0 = arith.constant 0 : i32
    %c0_i32_1 = arith.constant 0 : i32
    return %arg0, %c0_i32, %c0_i32_0 : i32, i32, i32
  }
}

</mosaic_0001>

<bundles_post_ra>
// kernel: tpu_custom_call.1
= control target key start
LH: loop header
LB: loop body
LE: loop exit
PB: predicated region body
PF: predicated region fallthrough
CT: control target
= control target key end

     0   :  { %vm43_vm0 = vcmask 130048   ;;  %s3048_s0 = inlined_call_operand.vmem [shape: f32[1,16,64], index: 0, kind: input, shape index: {}]   ;;  %s3049_s1 = inlined_call_operand.vmem [shape: f32[16,16], index: 1, kind: input, shape index: {}]   ;;  %s3050_s2 = inlined_call_operand.vmem [shape: f32[4,64], index: 2, kind: input, shape index: {}]   ;;  %s3051_s3 = inlined_call_operand.vmem [shape: f32[1,64], index: 3, kind: input, shape index: {}]   ;;  %s3052_s4 = inlined_call_operand.vmem [shape: f32[64,32], index: 4, kind: input, shape index: {}]   ;;  %s3053_s5 = inlined_call_operand.vmem [shape: f32[1,32], index: 5, kind: input, shape index: {}]   ;;  %s3054_s6 = inlined_call_operand.vmem [shape: f32[64,32], index: 6, kind: input, shape index: {}]   ;;  %s3055_s7 = inlined_call_operand.vmem [shape: f32[1,32], index: 7, kind: input, shape index: {}]   ;;  %s3056_s8 = inlined_call_operand.vmem [shape: f32[32,32], index: 8, kind: input, shape index: {}]   ;;  %s3057_s9 = inlined_call_operand.vmem [shape: f32[1,32], index: 9, kind: input, shape index: {}]   ;;  %s3058_s10 = inlined_call_operand.vmem [shape: f32[8,16,32], index: 10, kind: input, shape index: {}]   ;;  %s3059_s11 = inlined_call_operand.hbm [shape: f32[1,32,32], index: 11, kind: output, shape index: {}]  }
   0x1   :  { %v39_v0 = vld [vmem:[%s3048_s0] sm:$0xff]  ;;  %v40_v1 = vld [vmem:[%s3048_s0 + $0x8] sm:$0xff] }
   0x2   :  { %v41_v2 = vld [vmem:[%s3049_s1] sm:$0xff]  ;;  %v2058_v3 = vpack.c.bf16 %v40_v1, %v39_v0 }
   0x3   :  { %1863 = vmatprep.mubr.msk.f32.mxu0 %vm43_vm0, %v41_v2 }
   0x4   :  { %16 = vsyncpa [#allocation3], 0  ;;  %2059 = vmatprep.subr.bf16.mxu0 %v2058_v3  ;;  %v42_v4 = vld [vmem:[%s3049_s1 + $0x8] sm:$0xff]  ;;  %v187_v5 = vld [vmem:[%s3050_s2] sm:$0xf]  ;;  %vm260_vm1 = vcmask 1043456  }
   0x5   :  { %2061 = vmatpush3.bf16.msra.mxu0 %v2058_v3  ;;  %2102 = vmatprep.subr.msk.mxu1 %vm260_vm1, %v187_v5  ;;  %vm195_vm2 = vcmask 31744   ;;  %s2339_s0 = smov 120   ;;  %s2340_s27 = smov 124   ;;  %v489_v8 = vld [vmem:[%s3052_s4] sm:$0xff]  ;;  %v490_v9 = vld [vmem:[%s3052_s4 + $0x8] sm:$0xff]  ;;  %v491_v13 = vld [vmem:[%s3052_s4 + $0x10] sm:$0xff] }
   0x6   :  { %1866 = vmatprep.subr.msk.mxu0 %vm260_vm1, %v187_v5  ;;  %2103 = vmatpush3.msk.msra.mxu1 %vm260_vm1, %v187_v5  ;;  %s2341_s1 = smov 116   ;;  %s2342_s2 = smov 112   ;;  %v2062_v10 = vpack.c.bf16 %v490_v9, %v489_v8  ;;  %v1018_v11 = vld [vmem:[%s3054_s6] sm:$0xff]  ;;  %v1019_v12 = vld [vmem:[%s3054_s6 + $0x8] sm:$0xff]  ;;  %v492_v15 = vld [vmem:[%s3052_s4 + $0x18] sm:$0xff]  ;;  %vm504_vm3 = vcmask 523264  }
   0x7   :  { %s2343_s28 = smov 108   ;;  %s2344_s29 = smov 104   ;;  %v2078_v14 = vpack.c.bf16 %v1019_v12, %v1018_v11  ;;  %v2066_v16 = vpack.c.bf16 %v492_v15, %v491_v13  ;;  %v493_v17 = vld [vmem:[%s3052_s4 + $0x20] sm:$0xff]  ;;  %v494_v18 = vld [vmem:[%s3052_s4 + $0x28] sm:$0xff]  ;;  %v495_v20 = vld [vmem:[%s3052_s4 + $0x30] sm:$0xff]  ;;  %vm1386_vm4 = vcmask 261120  }
   0x8   :  { %1864 = vmatmul.mubr.msk.f32.vlgmr.msra.gmra.mrb[0].mxu0 %vm43_vm0, %v42_v4  ;;  %s2345_s30 = smov 100   ;;  %s2346_s12 = smov 96   ;;  %v2070_v19 = vpack.c.bf16 %v494_v18, %v493_v17  ;;  %v496_v21 = vld [vmem:[%s3052_s4 + $0x38] sm:$0xff]  ;;  %v1020_v33 = vld [vmem:[%s3054_s6 + $0x10] sm:$0xff]  ;;  %v1022_v38 = vld [vmem:[%s3054_s6 + $0x20] sm:$0xff] }
   0x9   :  { %1867 = vmatpush3.msk.msra.mxu0 %vm260_vm1, %v187_v5  ;;  %s2347_s13 = smov 92   ;;  %s2348_s14 = smov 88   ;;  %2079 = vmatprep.subr.bf16.mxu1 %v2078_v14  ;;  %v2074_v22 = vpack.c.bf16 %v496_v21, %v495_v20  ;;  %v1021_v34 = vld [vmem:[%s3054_s6 + $0x18] sm:$0xff]  ;;  %v1023_v39 = vld [vmem:[%s3054_s6 + $0x28] sm:$0xff]  ;;  %v1024_v43 = vld [vmem:[%s3054_s6 + $0x30] sm:$0xff] }
   0xa   :  { %s2349_s15 = smov 84   ;;  %s2350_s16 = smov 80   ;;  %2063 = vmatprep.subr.bf16.mxu0 %v2062_v10  ;;  %v2082_v37 = vpack.c.bf16 %v1021_v34, %v1020_v33  ;;  %v2086_v42 = vpack.c.bf16 %v1023_v39, %v1022_v38  ;;  %v1025_v44 = vld [vmem:[%s3054_s6 + $0x38] sm:$0xff]  ;;  %v2551_v62 = vld [vmem:[%s3051_s3] ss:$0 sm:$0xff] }
   0xb   :  { %v2090_v47 = vpack.c.bf16 %v1025_v44, %v1024_v43  ;;  %s2354_s23 = smov [#allocation2]  }
   0xc   :  { %s1584_s24 = sshll.u32 %s2354_s23, 4  ;;  %s1585_s24 = int_to_ptr.vmem [resolvable:$true] %s1584_s24 }
   0xd   :  { %p2320_p1 = scmp.lt.s32.totalorder %s1585_s24, %s1585_s24 }
  0xdb   :  { %v2432_v6 = vpop.f32.mrb[0].mxu0 }
  0xdc   :  { %v2434_v7 = vpop.f32.mrb[1].mxu0 }
  0xdd   :  { %131 = vrot.lane.b32.xlu1 %v2434_v7, %s2339_s0  ;;  %127 = vrot.lane.b32.xlu0 %v2434_v7, %s2340_s27 }
  0xde   :  { %1868 = vmatprep.mubr.msk.f32.mxu0 %vm195_vm2, %v2434_v7 }
  0xdf   :  { %1869 = vmatmul.mubr.msk.f32.vlgmr.msra.gmra.mrb[2].mxu0 %vm195_vm2, %v2432_v6 }
  0xe0   :  { %2065 = vmatpush3.bf16.msra.mxu0 %v2062_v10 }
  0xe1   :  { %133 = vrot.lane.b32.xlu1 %v2432_v6, %s2339_s0  ;;  %129 = vrot.lane.b32.xlu0 %v2432_v6, %s2340_s27 }
  0xe2   :  { %2067 = vmatprep.subr.bf16.mxu0 %v2066_v16 }
  0xe4   :  { %2069 = vmatpush3.bf16.msra.mxu0 %v2066_v16 }
  0xe5   :  { %137 = vrot.lane.b32.xlu1 %v2432_v6, %s2341_s1  ;;  %135 = vrot.lane.b32.xlu0 %v2434_v7, %s2341_s1 }
  0xe6   :  { %2071 = vmatprep.subr.bf16.mxu0 %v2070_v19 }
  0xe8   :  { %2073 = vmatpush3.bf16.msra.mxu0 %v2070_v19 }
  0xe9   :  { %141 = vrot.lane.b32.xlu1 %v2432_v6, %s2342_s2  ;;  %139 = vrot.lane.b32.xlu0 %v2434_v7, %s2342_s2 }
  0xea   :  { %2075 = vmatprep.subr.bf16.mxu0 %v2074_v22 }
  0xec   :  { %2077 = vmatpush3.bf16.msra.mxu0 %v2074_v22 }
  0xed   :  { %145 = vrot.lane.b32.xlu1 %v2432_v6, %s2343_s28  ;;  %143 = vrot.lane.b32.xlu0 %v2434_v7, %s2343_s28 }
  0xf1   :  { %149 = vrot.lane.b32.xlu1 %v2432_v6, %s2344_s29  ;;  %147 = vrot.lane.b32.xlu0 %v2434_v7, %s2344_s29 }
  0xf5   :  { %153 = vrot.lane.b32.xlu1 %v2432_v6, %s2345_s30  ;;  %151 = vrot.lane.b32.xlu0 %v2434_v7, %s2345_s30  ;;  %s2351_s30 = smov 76  }
  0xf9   :  { %157 = vrot.lane.b32.xlu1 %v2432_v6, %s2346_s12  ;;  %155 = vrot.lane.b32.xlu0 %v2434_v7, %s2346_s12  ;;  %s2352_s12 = smov 72  }
  0xfd   :  { %161 = vrot.lane.b32.xlu1 %v2432_v6, %s2347_s13  ;;  %159 = vrot.lane.b32.xlu0 %v2434_v7, %s2347_s13  ;;  %s2353_s13 = smov 68  }
 0x101   :  { %165 = vrot.lane.b32.xlu1 %v2432_v6, %s2348_s14  ;;  %163 = vrot.lane.b32.xlu0 %v2434_v7, %s2348_s14 }
 0x105   :  { %169 = vrot.lane.b32.xlu1 %v2432_v6, %s2349_s15  ;;  %167 = vrot.lane.b32.xlu0 %v2434_v7, %s2349_s15 }
 0x109   :  { %173 = vrot.lane.b32.xlu1 %v2432_v6, %s2350_s16  ;;  %171 = vrot.lane.b32.xlu0 %v2434_v7, %s2350_s16 }
 0x10d   :  { %177 = vrot.lane.b32.xlu1 %v2432_v6, %s2351_s30  ;;  %175 = vrot.lane.b32.xlu0 %v2434_v7, %s2351_s30 }
 0x111   :  { %181 = vrot.lane.b32.xlu1 %v2432_v6, %s2352_s12  ;;  %179 = vrot.lane.b32.xlu0 %v2434_v7, %s2352_s12 }
 0x115   :  { %185 = vrot.lane.b32.xlu1 %v2432_v6, %s2353_s13  ;;  %183 = vrot.lane.b32.xlu0 %v2434_v7, %s2353_s13 }
 0x14f   :  { %v132_v23 = vpop.permute.xlu1 %131  ;;  %v128_v24 = vpop.permute.xlu0 %127 }
 0x150   :  { %1871 = vmatprep.mubr.msk.f32.mxu0 %vm195_vm2, %v128_v24 }
 0x153   :  { %v134_v25 = vpop.permute.xlu1 %133  ;;  %v130_v26 = vpop.permute.xlu0 %129 }
 0x154   :  { %1872 = vmatmul.mubr.msk.f32.gmra.mrb[4].mxu0 %vm195_vm2, %v130_v26 }
 0x155   :  { %1874 = vmatprep.mubr.msk.f32.mxu0 %vm195_vm2, %v132_v23 }
 0x157   :  { %v138_v27 = vpop.permute.xlu1 %137  ;;  %v136_v28 = vpop.permute.xlu0 %135 }
 0x158   :  { %1875 = vmatmul.mubr.msk.f32.gmra.mrb[6].mxu0 %vm195_vm2, %v134_v25 }
 0x159   :  { %1877 = vmatprep.mubr.msk.f32.mxu0 %vm195_vm2, %v136_v28 }
 0x15b   :  { %v142_v29 = vpop.permute.xlu1 %141  ;;  %v140_v30 = vpop.permute.xlu0 %139 }
 0x15c   :  { %1878 = vmatmul.mubr.msk.f32.gmra.mrb[8].mxu0 %vm195_vm2, %v138_v27 }
 0x15d   :  { %1880 = vmatprep.mubr.msk.f32.mxu0 %vm195_vm2, %v140_v30 }
 0x15f   :  { %v146_v31 = vpop.permute.xlu1 %145  ;;  %v144_v32 = vpop.permute.xlu0 %143 }
 0x160   :  { %1881 = vmatmul.mubr.msk.f32.gmra.mrb[10].mxu0 %vm195_vm2, %v142_v29 }
 0x161   :  { %1883 = vmatprep.mubr.msk.f32.mxu0 %vm195_vm2, %v144_v32 }
 0x163   :  { %v150_v35 = vpop.permute.xlu1 %149  ;;  %v148_v36 = vpop.permute.xlu0 %147 }
 0x164   :  { %1884 = vmatmul.mubr.msk.f32.gmra.mrb[12].mxu0 %vm195_vm2, %v146_v31  ;;  %1886 = vmatprep.mubr.msk.f32.mxu1 %vm195_vm2, %v148_v36 }
 0x165   :  { %1887 = vmatmul.mubr.msk.f32.vlgmr.msra.gmra.mrb[0].mxu1 %vm195_vm2, %v150_v35 }
 0x166   :  { %2081 = vmatpush3.bf16.msra.mxu1 %v2078_v14 }
 0x167   :  { %v154_v40 = vpop.permute.xlu1 %153  ;;  %v152_v41 = vpop.permute.xlu0 %151  ;;  %2083 = vmatprep.subr.bf16.mxu1 %v2082_v37 }
 0x168   :  { %1889 = vmatprep.mubr.msk.f32.mxu1 %vm195_vm2, %v152_v41 }
 0x169   :  { %1890 = vmatmul.mubr.msk.f32.gmra.mrb[2].mxu1 %vm195_vm2, %v154_v40 }
 0x16a   :  { %2085 = vmatpush3.bf16.msra.mxu1 %v2082_v37 }
 0x16b   :  { %v158_v45 = vpop.permute.xlu1 %157  ;;  %v156_v46 = vpop.permute.xlu0 %155  ;;  %2087 = vmatprep.subr.bf16.mxu1 %v2086_v42 }
 0x16c   :  { %1892 = vmatprep.mubr.msk.f32.mxu1 %vm195_vm2, %v156_v46 }
 0x16d   :  { %1893 = vmatmul.mubr.msk.f32.gmra.mrb[4].mxu1 %vm195_vm2, %v158_v45 }
 0x16e   :  { %2089 = vmatpush3.bf16.msra.mxu1 %v2086_v42 }
 0x16f   :  { %v162_v48 = vpop.permute.xlu1 %161  ;;  %v160_v49 = vpop.permute.xlu0 %159  ;;  %2091 = vmatprep.subr.bf16.mxu1 %v2090_v47 }
 0x170   :  { %1895 = vmatprep.mubr.msk.f32.mxu1 %vm195_vm2, %v160_v49 }
 0x171   :  { %1896 = vmatmul.mubr.msk.f32.gmra.mrb[6].mxu1 %vm195_vm2, %v162_v48 }
 0x172   :  { %2093 = vmatpush3.bf16.msra.mxu1 %v2090_v47 }
 0x173   :  { %v166_v50 = vpop.permute.xlu1 %165  ;;  %v164_v51 = vpop.permute.xlu0 %163 }
 0x174   :  { %1898 = vmatprep.mubr.msk.f32.mxu1 %vm195_vm2, %v164_v51 }
 0x175   :  { %1899 = vmatmul.mubr.msk.f32.gmra.mrb[8].mxu1 %vm195_vm2, %v166_v50 }
 0x177   :  { %v170_v52 = vpop.permute.xlu1 %169  ;;  %v168_v53 = vpop.permute.xlu0 %167 }
 0x178   :  { %1901 = vmatprep.mubr.msk.f32.mxu1 %vm195_vm2, %v168_v53 }
 0x179   :  { %1902 = vmatmul.mubr.msk.f32.gmra.mrb[10].mxu1 %vm195_vm2, %v170_v52 }
 0x17b   :  { %v174_v54 = vpop.permute.xlu1 %173  ;;  %v172_v55 = vpop.permute.xlu0 %171 }
 0x17c   :  { %1904 = vmatprep.mubr.msk.f32.mxu1 %vm195_vm2, %v172_v55 }
 0x17d   :  { %1905 = vmatmul.mubr.msk.f32.gmra.mrb[12].mxu1 %vm195_vm2, %v174_v54 }
 0x17f   :  { %v178_v56 = vpop.permute.xlu1 %177  ;;  %v176_v57 = vpop.permute.xlu0 %175 }
 0x180   :  { %1907 = vmatprep.mubr.msk.f32.mxu1 %vm195_vm2, %v176_v57 }
 0x181   :  { %1908 = vmatmul.mubr.msk.f32.gmra.mrb[14].mxu1 %vm195_vm2, %v178_v56 }
 0x183   :  { %v182_v58 = vpop.permute.xlu1 %181  ;;  %v180_v59 = vpop.permute.xlu0 %179 }
 0x184   :  { %1910 = vmatprep.mubr.msk.f32.mxu1 %vm195_vm2, %v180_v59 }
 0x185   :  { %1911 = vmatmul.mubr.msk.f32.gmra.mrb[16].mxu1 %vm195_vm2, %v182_v58 }
 0x187   :  { %v186_v60 = vpop.permute.xlu1 %185  ;;  %v184_v61 = vpop.permute.xlu0 %183 }
 0x188   :  { %1913 = vmatprep.mubr.msk.f32.mxu1 %vm195_vm2, %v184_v61 }
 0x189   :  { %1914 = vmatmul.mubr.msk.f32.gmra.mrb[18].mxu1 %vm195_vm2, %v186_v60 }
 0x1b2   :  { %v1870_v63 = vpop.f32.mrb[2].mxu0 }
 0x1b3   :  { %v330_v0 = vpop.f32.mrb[3].mxu0  ;;  %v336_v2 = vadd.f32 %v1870_v63, %v2551_v62 }
 0x1b4   :  { %v331_v1 = vadd.f32 %v2551_v62, %v330_v0  ;;  %v2652_v0 = vld [vmem:[%s3053_s5] ss:$0 sm:$0xff] }
 0x1b6   :  { %1932 = vmatprep.mubr.msk.f32.mxu0 %vm504_vm3, %v331_v1  ;;  %1996 = vmatprep.mubr.msk.f32.mxu1 %vm504_vm3, %v331_v1 }
 0x1b7   :  { %1933 = vmatmul.mubr.msk.f32.vlgmr.msra.gmra.mrb[14].mxu0 %vm504_vm3, %v336_v2  ;;  %1997 = vmatmul.mubr.msk.f32.vlgmr.msra.gmra.mrb[20].mxu1 %vm504_vm3, %v336_v2 }
 0x227   :  { %v1873_v3 = vpop.f32.mrb[4].mxu0 }
 0x228   :  { %v340_v4 = vpop.f32.mrb[5].mxu0  ;;  %v346_v6 = vadd.f32 %v1873_v3, %v2551_v62 }
 0x229   :  { %v341_v5 = vadd.f32 %v2551_v62, %v340_v4 }
 0x22b   :  { %v1876_v7 = vpop.f32.mrb[6].mxu0  ;;  %1935 = vmatprep.mubr.msk.f32.mxu0 %vm504_vm3, %v341_v5  ;;  %1999 = vmatprep.mubr.msk.f32.mxu1 %vm504_vm3, %v341_v5 }
 0x22c   :  { %v350_v8 = vpop.f32.mrb[7].mxu0  ;;  %1936 = vmatmul.mubr.msk.f32.gmra.mrb[16].mxu0 %vm504_vm3, %v346_v6  ;;  %2000 = vmatmul.mubr.msk.f32.gmra.mrb[22].mxu1 %vm504_vm3, %v346_v6  ;;  %v356_v10 = vadd.f32 %v1876_v7, %v2551_v62 }
 0x22d   :  { %v351_v9 = vadd.f32 %v2551_v62, %v350_v8 }
 0x22f   :  { %v1879_v11 = vpop.f32.mrb[8].mxu0  ;;  %1938 = vmatprep.mubr.msk.f32.mxu0 %vm504_vm3, %v351_v9  ;;  %2002 = vmatprep.mubr.msk.f32.mxu1 %vm504_vm3, %v351_v9 }
 0x230   :  { %v360_v12 = vpop.f32.mrb[9].mxu0  ;;  %1939 = vmatmul.mubr.msk.f32.gmra.mrb[18].mxu0 %vm504_vm3, %v356_v10  ;;  %2003 = vmatmul.mubr.msk.f32.gmra.mrb[24].mxu1 %vm504_vm3, %v356_v10  ;;  %v366_v14 = vadd.f32 %v1879_v11, %v2551_v62 }
 0x231   :  { %v361_v13 = vadd.f32 %v2551_v62, %v360_v12 }
 0x233   :  { %v1882_v15 = vpop.f32.mrb[10].mxu0  ;;  %1941 = vmatprep.mubr.msk.f32.mxu0 %vm504_vm3, %v361_v13  ;;  %2005 = vmatprep.mubr.msk.f32.mxu1 %vm504_vm3, %v361_v13 }
 0x234   :  { %v370_v16 = vpop.f32.mrb[11].mxu0  ;;  %1942 = vmatmul.mubr.msk.f32.gmra.mrb[20].mxu0 %vm504_vm3, %v366_v14  ;;  %2006 = vmatmul.mubr.msk.f32.gmra.mrb[26].mxu1 %vm504_vm3, %v366_v14  ;;  %v376_v18 = vadd.f32 %v1882_v15, %v2551_v62 }
 0x235   :  { %v371_v17 = vadd.f32 %v2551_v62, %v370_v16 }
 0x237   :  { %v1885_v19 = vpop.f32.mrb[12].mxu0  ;;  %1944 = vmatprep.mubr.msk.f32.mxu0 %vm504_vm3, %v371_v17  ;;  %2008 = vmatprep.mubr.msk.f32.mxu1 %vm504_vm3, %v371_v17 }
 0x238   :  { %v380_v20 = vpop.f32.mrb[13].mxu0  ;;  %v1888_v21 = vpop.f32.mrb[0].mxu1  ;;  %1945 = vmatmul.mubr.msk.f32.gmra.mrb[22].mxu0 %vm504_vm3, %v376_v18  ;;  %2009 = vmatmul.mubr.msk.f32.gmra.mrb[28].mxu1 %vm504_vm3, %v376_v18  ;;  %v386_v24 = vadd.f32 %v1885_v19, %v2551_v62 }
 0x239   :  { %v381_v22 = vadd.f32 %v2551_v62, %v380_v20  ;;  %v390_v23 = vpop.f32.mrb[1].mxu1  ;;  %v396_v28 = vadd.f32 %v1888_v21, %v2551_v62 }
 0x23a   :  { %v391_v25 = vadd.f32 %v2551_v62, %v390_v23  ;;  %v1467_v23 = vld [vmem:[%s3056_s8] sm:$0xff] }
 0x23b   :  { %1947 = vmatprep.mubr.msk.f32.mxu0 %vm504_vm3, %v381_v22  ;;  %2011 = vmatprep.mubr.msk.f32.mxu1 %vm504_vm3, %v381_v22 }
 0x23c   :  { %v1891_v26 = vpop.f32.mrb[2].mxu1  ;;  %1948 = vmatmul.mubr.msk.f32.gmra.mrb[24].mxu0 %vm504_vm3, %v386_v24  ;;  %2012 = vmatmul.mubr.msk.f32.gmra.mrb[30].mxu1 %vm504_vm3, %v386_v24  ;;  %v1468_v24 = vld [vmem:[%s3056_s8 + $0x8] sm:$0xff] }
 0x23d   :  { %v400_v27 = vpop.f32.mrb[3].mxu1  ;;  %1950 = vmatprep.mubr.msk.f32.mxu0 %vm504_vm3, %v391_v25  ;;  %2014 = vmatprep.mubr.msk.f32.mxu1 %vm504_vm3, %v391_v25  ;;  %v406_v32 = vadd.f32 %v1891_v26, %v2551_v62  ;;  %v2094_v25 = vpack.c.bf16 %v1468_v24, %v1467_v23  ;;  %v1469_v26 = vld [vmem:[%s3056_s8 + $0x10] sm:$0xff] }
 0x23e   :  { %v401_v29 = vadd.f32 %v2551_v62, %v400_v27  ;;  %v1470_v27 = vld [vmem:[%s3056_s8 + $0x18] sm:$0xff] }
 0x23f   :  { %2095 = vmatprep.subr.bf16.mxu0 %v2094_v25 }
 0x240   :  { %v1894_v30 = vpop.f32.mrb[4].mxu1  ;;  %1951 = vmatmul.mubr.msk.f32.gmra.mrb[26].mxu0 %vm504_vm3, %v396_v28  ;;  %2015 = vmatmul.mubr.msk.f32.gmra.mrb[32].mxu1 %vm504_vm3, %v396_v28  ;;  %v2098_v28 = vpack.c.bf16 %v1470_v27, %v1469_v26 }
 0x241   :  { %v410_v31 = vpop.f32.mrb[5].mxu1  ;;  %1953 = vmatprep.mubr.msk.f32.mxu0 %vm504_vm3, %v401_v29  ;;  %2017 = vmatprep.mubr.msk.f32.mxu1 %vm504_vm3, %v401_v29  ;;  %v416_v36 = vadd.f32 %v1894_v30, %v2551_v62 }
 0x242   :  { %v411_v33 = vadd.f32 %v2551_v62, %v410_v31  ;;  %2097 = vmatpush3.bf16.msra.mxu0 %v2094_v25 }
 0x243   :  { %2099 = vmatprep.subr.bf16.mxu0 %v2098_v28 }
 0x244   :  { %v1897_v34 = vpop.f32.mrb[6].mxu1  ;;  %1954 = vmatmul.mubr.msk.f32.gmra.mrb[28].mxu0 %vm504_vm3, %v406_v32  ;;  %2018 = vmatmul.mubr.msk.f32.gmra.mrb[34].mxu1 %vm504_vm3, %v406_v32 }
 0x245   :  { %v420_v35 = vpop.f32.mrb[7].mxu1  ;;  %1956 = vmatprep.mubr.msk.f32.mxu0 %vm504_vm3, %v411_v33  ;;  %2020 = vmatprep.mubr.msk.f32.mxu1 %vm504_vm3, %v411_v33  ;;  %v426_v40 = vadd.f32 %v1897_v34, %v2551_v62 }
 0x246   :  { %v421_v37 = vadd.f32 %v2551_v62, %v420_v35  ;;  %2101 = vmatpush3.bf16.msra.mxu0 %v2098_v28 }
 0x248   :  { %v1900_v38 = vpop.f32.mrb[8].mxu1  ;;  %1957 = vmatmul.mubr.msk.f32.gmra.mrb[30].mxu0 %vm504_vm3, %v416_v36  ;;  %2021 = vmatmul.mubr.msk.f32.gmra.mrb[36].mxu1 %vm504_vm3, %v416_v36 }
 0x249   :  { %v430_v39 = vpop.f32.mrb[9].mxu1  ;;  %1959 = vmatprep.mubr.msk.f32.mxu0 %vm504_vm3, %v421_v37  ;;  %2023 = vmatprep.mubr.msk.f32.mxu1 %vm504_vm3, %v421_v37  ;;  %v436_v44 = vadd.f32 %v1900_v38, %v2551_v62 }
 0x24a   :  { %v431_v41 = vadd.f32 %v2551_v62, %v430_v39 }
 0x24c   :  { %v1903_v42 = vpop.f32.mrb[10].mxu1  ;;  %1960 = vmatmul.mubr.msk.f32.gmra.mrb[32].mxu0 %vm504_vm3, %v426_v40  ;;  %2024 = vmatmul.mubr.msk.f32.gmra.mrb[38].mxu1 %vm504_vm3, %v426_v40 }
 0x24d   :  { %v440_v43 = vpop.f32.mrb[11].mxu1  ;;  %1962 = vmatprep.mubr.msk.f32.mxu0 %vm504_vm3, %v431_v41  ;;  %2026 = vmatprep.mubr.msk.f32.mxu1 %vm504_vm3, %v431_v41  ;;  %v446_v48 = vadd.f32 %v1903_v42, %v2551_v62 }
 0x24e   :  { %v441_v45 = vadd.f32 %v2551_v62, %v440_v43 }
 0x250   :  { %v1906_v46 = vpop.f32.mrb[12].mxu1  ;;  %1963 = vmatmul.mubr.msk.f32.gmra.mrb[34].mxu0 %vm504_vm3, %v436_v44  ;;  %2027 = vmatmul.mubr.msk.f32.gmra.mrb[40].mxu1 %vm504_vm3, %v436_v44 }
 0x251   :  { %v450_v47 = vpop.f32.mrb[13].mxu1  ;;  %1965 = vmatprep.mubr.msk.f32.mxu0 %vm504_vm3, %v441_v45  ;;  %2029 = vmatprep.mubr.msk.f32.mxu1 %vm504_vm3, %v441_v45  ;;  %v456_v52 = vadd.f32 %v1906_v46, %v2551_v62 }
 0x252   :  { %v451_v49 = vadd.f32 %v2551_v62, %v450_v47 }
 0x254   :  { %v1909_v50 = vpop.f32.mrb[14].mxu1  ;;  %1966 = vmatmul.mubr.msk.f32.gmra.mrb[36].mxu0 %vm504_vm3, %v446_v48  ;;  %2030 = vmatmul.mubr.msk.f32.gmra.mrb[42].mxu1 %vm504_vm3, %v446_v48 }
 0x255   :  { %v460_v51 = vpop.f32.mrb[15].mxu1  ;;  %1968 = vmatprep.mubr.msk.f32.mxu0 %vm504_vm3, %v451_v49  ;;  %2032 = vmatprep.mubr.msk.f32.mxu1 %vm504_vm3, %v451_v49  ;;  %v466_v56 = vadd.f32 %v1909_v50, %v2551_v62 }
 0x256   :  { %v461_v53 = vadd.f32 %v2551_v62, %v460_v51 }
 0x258   :  { %v1912_v54 = vpop.f32.mrb[16].mxu1  ;;  %1969 = vmatmul.mubr.msk.f32.gmra.mrb[38].mxu0 %vm504_vm3, %v456_v52  ;;  %2033 = vmatmul.mubr.msk.f32.gmra.mrb[44].mxu1 %vm504_vm3, %v456_v52 }
 0x259   :  { %v470_v55 = vpop.f32.mrb[17].mxu1  ;;  %1971 = vmatprep.mubr.msk.f32.mxu0 %vm504_vm3, %v461_v53  ;;  %2035 = vmatprep.mubr.msk.f32.mxu1 %vm504_vm3, %v461_v53  ;;  %v476_v60 = vadd.f32 %v1912_v54, %v2551_v62 }
 0x25a   :  { %v471_v57 = vadd.f32 %v2551_v62, %v470_v55 }
 0x25c   :  { %v1915_v58 = vpop.f32.mrb[18].mxu1  ;;  %1972 = vmatmul.mubr.msk.f32.gmra.mrb[40].mxu0 %vm504_vm3, %v466_v56  ;;  %2036 = vmatmul.mubr.msk.f32.gmra.mrb[46].mxu1 %vm504_vm3, %v466_v56 }
 0x25d   :  { %v480_v59 = vpop.f32.mrb[19].mxu1  ;;  %1974 = vmatprep.mubr.msk.f32.mxu0 %vm504_vm3, %v471_v57  ;;  %2038 = vmatprep.mubr.msk.f32.mxu1 %vm504_vm3, %v471_v57  ;;  %v486_v63 = vadd.f32 %v1915_v58, %v2551_v62 }
 0x25e   :  { %v481_v61 = vadd.f32 %v2551_v62, %v480_v59  ;;  %v2659_v62 = vld [vmem:[%s3055_s7] ss:$0 sm:$0xff] }
 0x260   :  { %1975 = vmatmul.mubr.msk.f32.gmra.mrb[42].mxu0 %vm504_vm3, %v476_v60  ;;  %2039 = vmatmul.mubr.msk.f32.gmra.mrb[48].mxu1 %vm504_vm3, %v476_v60 }
 0x261   :  { %1977 = vmatprep.mubr.msk.f32.mxu0 %vm504_vm3, %v481_v61  ;;  %2041 = vmatprep.mubr.msk.f32.mxu1 %vm504_vm3, %v481_v61 }
 0x264   :  { %1978 = vmatmul.mubr.msk.f32.gmra.mrb[44].mxu0 %vm504_vm3, %v486_v63  ;;  %2042 = vmatmul.mubr.msk.f32.gmra.mrb[50].mxu1 %vm504_vm3, %v486_v63 }
 0x28a   :  { %v1934_v1 = vpop.f32.mrb[14].mxu0  ;;  %v1998_v2 = vpop.f32.mrb[20].mxu1 }
 0x28b   :  { %v673_v3 = vadd.f32 %v1934_v1, %v2652_v0  ;;  %v667_v4 = vpop.f32.mrb[15].mxu0  ;;  %v1099_v5 = vpop.f32.mrb[21].mxu1  ;;  %v1105_v12 = vadd.f32 %v1998_v2, %v2659_v62 }
 0x28c   :  { %v668_v6 = vadd.f32 %v2652_v0, %v667_v4  ;;  %v1100_v14 = vadd.f32 %v2659_v62, %v1099_v5 }
 0x28d   :  { %v1665_v7 = vmul.f32 -1.442695, %v673_v3 }
 0x28e   :  { %v1664_v8 = vmul.f32 -1.442695, %v668_v6 }
 0x28f   :  { %2122 = vpow2.f32 %v1665_v7 }
 0x290   :  { %2124 = vpow2.f32 %v1664_v8 }
 0x299   :  { %v2123_v9 = vpop.eup %2122 }
 0x29a   :  { %v2125_v10 = vpop.eup %2124  ;;  %v923_v11 = vadd.f32 1.0, %v2123_v9 }
 0x29b   :  { %v922_v13 = vadd.f32 1.0, %v2125_v10 }
 0x29c   :  { %2126 = vrcp.f32 %v923_v11 }
 0x29d   :  { %2128 = vrcp.f32 %v922_v13 }
 0x29e   :  { %2130 = vtanh.f32 %v1105_v12 }
 0x29f   :  { %2132 = vtanh.f32 %v1100_v14 }
 0x2a6   :  { %v2127_v15 = vpop.eup %2126 }
 0x2a7   :  { %v2129_v16 = vpop.eup %2128  ;;  %v1291_v17 = vsub.f32 1.0, %v2127_v15 }
 0x2a8   :  { %v2131_v18 = vpop.eup %2130  ;;  %v1290_v19 = vsub.f32 1.0, %v2129_v16 }
 0x2a9   :  { %v2133_v20 = vpop.eup %2132  ;;  %v2663_v21 = vmul.f32 %v2131_v18, %v1291_v17 }
 0x2aa   :  { %v2665_v22 = vmul.f32 %v2133_v20, %v1290_v19 }
 0x2ff   :  { %v1937_v29 = vpop.f32.mrb[16].mxu0  ;;  %v2001_v30 = vpop.f32.mrb[22].mxu1 }
 0x300   :  { %v683_v31 = vadd.f32 %v1937_v29, %v2652_v0  ;;  %v1115_v32 = vadd.f32 %v2001_v30, %v2659_v62  ;;  %v677_v33 = vpop.f32.mrb[17].mxu0  ;;  %v1109_v34 = vpop.f32.mrb[23].mxu1 }
 0x301   :  { %v678_v35 = vadd.f32 %v2652_v0, %v677_v33  ;;  %v1110_v37 = vadd.f32 %v2659_v62, %v1109_v34 }
 0x302   :  { %v1667_v36 = vmul.f32 -1.442695, %v683_v31  ;;  %2134 = vtanh.f32 %v1115_v32 }
 0x303   :  { %v1666_v38 = vmul.f32 -1.442695, %v678_v35  ;;  %v1940_v39 = vpop.f32.mrb[18].mxu0  ;;  %v2004_v40 = vpop.f32.mrb[24].mxu1  ;;  %v2711_v35 = vld [vmem:[%s3058_s10 + $0x8] sm:$0xff] }
 0x304   :  { %2136 = vpow2.f32 %v1667_v36  ;;  %v693_v41 = vadd.f32 %v1940_v39, %v2652_v0  ;;  %v1125_v42 = vadd.f32 %v2004_v40, %v2659_v62  ;;  %v687_v43 = vpop.f32.mrb[19].mxu0  ;;  %v1119_v44 = vpop.f32.mrb[25].mxu1 }
 0x305   :  { %2138 = vpow2.f32 %v1666_v38  ;;  %v688_v45 = vadd.f32 %v2652_v0, %v687_v43  ;;  %v1120_v47 = vadd.f32 %v2659_v62, %v1119_v44 }
 0x306   :  { %2140 = vtanh.f32 %v1110_v37  ;;  %v1669_v46 = vmul.f32 -1.442695, %v693_v41  ;;  %v2716_v37 = vld [vmem:[%s3058_s10] sm:$0xff] }
 0x307   :  { %2142 = vtanh.f32 %v1125_v42  ;;  %v1668_v48 = vmul.f32 -1.442695, %v688_v45  ;;  %v1943_v49 = vpop.f32.mrb[20].mxu0  ;;  %v2007_v50 = vpop.f32.mrb[26].mxu1  ;;  %v1371_v45 = vmul.f32 %v2711_v35, %v2663_v21 }
 0x308   :  { %2144 = vpow2.f32 %v1669_v46  ;;  %v703_v51 = vadd.f32 %v1943_v49, %v2652_v0  ;;  %v1135_v52 = vadd.f32 %v2007_v50, %v2659_v62  ;;  %v697_v53 = vpop.f32.mrb[21].mxu0  ;;  %v1129_v54 = vpop.f32.mrb[27].mxu1 }
 0x309   :  { %2146 = vpow2.f32 %v1668_v48  ;;  %v698_v55 = vadd.f32 %v2652_v0, %v697_v53  ;;  %v1130_v57 = vadd.f32 %v2659_v62, %v1129_v54 }
 0x30a   :  { %2148 = vtanh.f32 %v1120_v47  ;;  %v1671_v56 = vmul.f32 -1.442695, %v703_v51  ;;  %v1370_v51 = vmul.f32 %v2716_v37, %v2665_v22 }
 0x30b   :  { %2150 = vtanh.f32 %v1135_v52  ;;  %v1670_v58 = vmul.f32 -1.442695, %v698_v55  ;;  %v1946_v59 = vpop.f32.mrb[22].mxu0  ;;  %v2010_v60 = vpop.f32.mrb[28].mxu1 }
 0x30c   :  { %2152 = vpow2.f32 %v1671_v56  ;;  %v713_v61 = vadd.f32 %v1946_v59, %v2652_v0  ;;  %v1145_v63 = vadd.f32 %v2010_v60, %v2659_v62  ;;  %v707_v1 = vpop.f32.mrb[23].mxu0  ;;  %v1139_v2 = vpop.f32.mrb[29].mxu1  ;;  %v1402_v59 = vsel %vm1386_vm4, %v1371_v45, 0.0 }
 0x30d   :  { %v2693_v3 = vpop.eup %2134  ;;  %2154 = vpow2.f32 %v1670_v58  ;;  %v708_v4 = vadd.f32 %v2652_v0, %v707_v1  ;;  %v1140_v25 = vadd.f32 %v2659_v62, %v1139_v2  ;;  %v1387_v2 = vsel %vm1386_vm4, %v1370_v51, 0.0 }
 0x30e   :  { %v2137_v5 = vpop.eup %2136  ;;  %2156 = vtanh.f32 %v1130_v57  ;;  %v1673_v6 = vmul.f32 -1.442695, %v713_v61 }
 0x30f   :  { %v2139_v7 = vpop.eup %2138  ;;  %v925_v8 = vadd.f32 1.0, %v2137_v5  ;;  %2158 = vtanh.f32 %v1145_v63  ;;  %v1672_v9 = vmul.f32 -1.442695, %v708_v4  ;;  %v1949_v10 = vpop.f32.mrb[24].mxu0  ;;  %v2743_v4 = vld [vmem:[%s3058_s10 + $0x18] sm:$0xff] }
 0x310   :  { %v2013_v11 = vpop.f32.mrb[30].mxu1  ;;  %v2696_v12 = vpop.eup %2140  ;;  %v924_v13 = vadd.f32 1.0, %v2139_v7  ;;  %2160 = vpow2.f32 %v1673_v6  ;;  %v723_v14 = vadd.f32 %v1949_v10, %v2652_v0 }
 0x311   :  { %v717_v15 = vpop.f32.mrb[25].mxu0  ;;  %v1149_v16 = vpop.f32.mrb[31].mxu1  ;;  %2162 = vrcp.f32 %v925_v8  ;;  %v1155_v40 = vadd.f32 %v2013_v11, %v2659_v62 }
 0x312   :  { %v2699_v17 = vpop.eup %2142  ;;  %v718_v18 = vadd.f32 %v2652_v0, %v717_v15  ;;  %2164 = vrcp.f32 %v924_v13  ;;  %v1675_v20 = vmul.f32 -1.442695, %v723_v14  ;;  %v1150_v53 = vadd.f32 %v2659_v62, %v1149_v16 }
 0x313   :  { %v2145_v19 = vpop.eup %2144  ;;  %2166 = vpow2.f32 %v1672_v9  ;;  %v1952_v26 = vpop.f32.mrb[26].mxu0  ;;  %v2750_v9 = vld [vmem:[%s3058_s10 + $0x10] sm:$0xff] }
 0x314   :  { %v2147_v23 = vpop.eup %2146  ;;  %v927_v24 = vadd.f32 1.0, %v2145_v19  ;;  %v2016_v27 = vpop.f32.mrb[32].mxu1  ;;  %2168 = vpow2.f32 %v1675_v20  ;;  %v1674_v30 = vmul.f32 -1.442695, %v718_v18  ;;  %v733_v31 = vadd.f32 %v1952_v26, %v2652_v0 }
 0x315   :  { %v2703_v28 = vpop.eup %2148  ;;  %v926_v29 = vadd.f32 1.0, %v2147_v23  ;;  %v727_v32 = vpop.f32.mrb[27].mxu0  ;;  %v1165_v11 = vadd.f32 %v2016_v27, %v2659_v62 }
 0x316   :  { %v1159_v33 = vpop.f32.mrb[33].mxu1  ;;  %v2706_v34 = vpop.eup %2150  ;;  %2170 = vrcp.f32 %v927_v24  ;;  %v728_v41 = vadd.f32 %v2652_v0, %v727_v32  ;;  %v1677_v47 = vmul.f32 -1.442695, %v733_v31 }
 0x317   :  { %v2153_v36 = vpop.eup %2152  ;;  %2172 = vrcp.f32 %v926_v29  ;;  %v1955_v42 = vpop.f32.mrb[28].mxu0  ;;  %v2755_v16 = vadd.f32 %v2659_v62, %v1159_v33  ;;  %v2770_v29 = vld [vmem:[%s3058_s10 + $0x28] sm:$0xff] }
 0x318   :  { %v2155_v38 = vpop.eup %2154  ;;  %v929_v39 = vadd.f32 1.0, %v2153_v36  ;;  %2174 = vtanh.f32 %v1140_v25  ;;  %v2720_v43 = vpop.f32.mrb[34].mxu1  ;;  %v1676_v21 = vmul.f32 -1.442695, %v728_v41  ;;  %v743_v61 = vadd.f32 %v1955_v42, %v2652_v0 }
 0x319   :  { %v2722_v44 = vpop.eup %2156  ;;  %v928_v46 = vadd.f32 1.0, %v2155_v38  ;;  %2176 = vpow2.f32 %v1674_v30  ;;  %v737_v48 = vpop.f32.mrb[29].mxu0  ;;  %v2777_v38 = vld [vmem:[%s3058_s10 + $0x20] sm:$0xff] }
 0x31a   :  { %v2726_v49 = vpop.f32.mrb[35].mxu1  ;;  %v2728_v50 = vpop.eup %2158  ;;  %2178 = vrcp.f32 %v929_v39  ;;  %v738_v6 = vadd.f32 %v2652_v0, %v737_v48  ;;  %v1679_v24 = vmul.f32 -1.442695, %v743_v61 }
 0x31b   :  { %v2161_v52 = vpop.eup %2160  ;;  %2180 = vrcp.f32 %v928_v46  ;;  %v1958_v56 = vpop.f32.mrb[30].mxu0 }
 0x31c   :  { %v2163_v54 = vpop.eup %2162  ;;  %v931_v55 = vadd.f32 1.0, %v2161_v52  ;;  %2182 = vtanh.f32 %v1155_v40  ;;  %v2733_v57 = vpop.f32.mrb[36].mxu1  ;;  %v1678_v31 = vmul.f32 -1.442695, %v738_v6  ;;  %v753_v39 = vadd.f32 %v1958_v56, %v2652_v0 }
 0x31d   :  { %v2165_v58 = vpop.eup %2164  ;;  %v1293_v60 = vsub.f32 1.0, %v2163_v54  ;;  %2184 = vpow2.f32 %v1677_v47  ;;  %v747_v22 = vpop.f32.mrb[31].mxu0 }
 0x31e   :  { %v2737_v63 = vpop.f32.mrb[37].mxu1  ;;  %v2167_v1 = vpop.eup %2166  ;;  %v1292_v5 = vsub.f32 1.0, %v2165_v58  ;;  %2186 = vrcp.f32 %v931_v55 }
 0x31f   :  { %v2169_v7 = vpop.eup %2168  ;;  %v1325_v8 = vmul.f32 %v2693_v3, %v1293_v60  ;;  %v930_v10 = vadd.f32 1.0, %v2167_v1  ;;  %2188 = vtanh.f32 %v1150_v53  ;;  %v1961_v18 = vpop.f32.mrb[32].mxu0 }
 0x320   :  { %v2171_v13 = vpop.eup %2170  ;;  %v1324_v14 = vmul.f32 %v2696_v12, %v1292_v5  ;;  %v933_v15 = vadd.f32 1.0, %v2169_v7  ;;  %2190 = vpow2.f32 %v1676_v21  ;;  %v2757_v19 = vpop.f32.mrb[38].mxu1  ;;  %v763_v5 = vadd.f32 %v1961_v18, %v2652_v0 }
 0x321   :  { %v2173_v3 = vpop.eup %2172  ;;  %v1373_v20 = vmul.f32 %v2743_v4, %v1325_v8  ;;  %v1295_v23 = vsub.f32 1.0, %v2171_v13  ;;  %2192 = vrcp.f32 %v930_v10  ;;  %v2760_v25 = vpop.f32.mrb[33].mxu0 }
 0x322   :  { %v2762_v26 = vpop.f32.mrb[39].mxu1  ;;  %v2764_v27 = vpop.eup %2174  ;;  %v1372_v12 = vmul.f32 %v2750_v9, %v1324_v14  ;;  %v1294_v30 = vsub.f32 1.0, %v2173_v3  ;;  %2194 = vrcp.f32 %v933_v15 }
 0x323   :  { %v2177_v32 = vpop.eup %2176  ;;  %v1403_v33 = vsel %vm1386_vm4, %v1373_v20, 0.0  ;;  %v1327_v36 = vmul.f32 %v2699_v17, %v1295_v23  ;;  %2196 = vtanh.f32 %v1165_v11  ;;  %v2782_v47 = vpop.f32.mrb[34].mxu0 }
 0x324   :  { %v2179_v40 = vpop.eup %2178  ;;  %v1404_v41 = vadd.f32 %v1403_v33, %v1402_v59  ;;  %v1388_v42 = vsel %vm1386_vm4, %v1372_v12, 0.0  ;;  %v1326_v45 = vmul.f32 %v2703_v28, %v1294_v30  ;;  %v932_v46 = vadd.f32 1.0, %v2177_v32  ;;  %v2784_v48 = vpop.f32.mrb[40].mxu1  ;;  %v2795_v28 = vld [vmem:[%s3058_s10 + $0x38] sm:$0xff] }
 0x325   :  { %v2181_v17 = vpop.eup %2180  ;;  %v1389_v51 = vadd.f32 %v1388_v42, %v1387_v2  ;;  %v1375_v52 = vmul.f32 %v2770_v29, %v1327_v36  ;;  %v1297_v53 = vsub.f32 1.0, %v2179_v40  ;;  %2198 = vpow2.f32 %v1679_v24  ;;  %v2787_v54 = vpop.f32.mrb[35].mxu0 }
 0x326   :  { %v2789_v55 = vpop.f32.mrb[41].mxu1  ;;  %v2183_v21 = vpop.eup %2182  ;;  %v1374_v56 = vmul.f32 %v2777_v38, %v1326_v45  ;;  %v1296_v58 = vsub.f32 1.0, %v2181_v17  ;;  %2200 = vrcp.f32 %v932_v46  ;;  %v748_v59 = vadd.f32 %v2652_v0, %v747_v22 }
 0x327   :  { %v2185_v60 = vpop.eup %2184  ;;  %v1405_v61 = vsel %vm1386_vm4, %v1375_v52, 0.0  ;;  %v1329_v1 = vmul.f32 %v2706_v34, %v1297_v53  ;;  %v1681_v2 = vmul.f32 -1.442695, %v753_v39  ;;  %v2805_v13 = vpop.f32.mrb[36].mxu0  ;;  %2202 = vpow2.f32 %v1678_v31 }
 0x328   :  { %v2187_v6 = vpop.eup %2186  ;;  %v1406_v7 = vadd.f32 %v1405_v61, %v1404_v41  ;;  %v1390_v8 = vsel %vm1386_vm4, %v1374_v56, 0.0  ;;  %v2803_v10 = vmul.f32 %v2722_v44, %v1296_v58  ;;  %v935_v11 = vadd.f32 1.0, %v2185_v60  ;;  %v2807_v14 = vpop.f32.mrb[42].mxu1  ;;  %v2819_v44 = vld [vmem:[%s3058_s10 + $0x48] sm:$0xff] }
 0x329   :  { %v2189_v22 = vpop.eup %2188  ;;  %v2809_v15 = vadd.f32 %v1390_v8, %v1389_v51  ;;  %v1377_v34 = vmul.f32 %v2795_v28, %v1329_v1  ;;  %v1299_v3 = vsub.f32 1.0, %v2187_v6  ;;  %v2812_v18 = vpop.f32.mrb[37].mxu0  ;;  %v1175_v24 = vadd.f32 %v2720_v43, %v2659_v62 }
 0x32a   :  { %v2814_v20 = vpop.f32.mrb[43].mxu1  ;;  %v2191_v23 = vpop.eup %2190  ;;  %2204 = vrcp.f32 %v935_v11  ;;  %v1170_v12 = vadd.f32 %v2659_v62, %v2726_v49  ;;  %v1680_v30 = vmul.f32 -1.442695, %v748_v59  ;;  %v758_v42 = vadd.f32 %v2652_v0, %v2760_v25  ;;  %v2845_v25 = vld [vmem:[%s3058_s10 + $0x58] sm:$0xff] }
 0x32b   :  { %v2193_v32 = vpop.eup %2192  ;;  %v1407_v31 = vsel %vm1386_vm4, %v1377_v34, 0.0  ;;  %v1331_v33 = vmul.f32 %v2728_v50, %v1299_v3  ;;  %v934_v36 = vadd.f32 1.0, %v2191_v23  ;;  %2206 = vtanh.f32 %v2755_v16  ;;  %v2830_v43 = vpop.f32.mrb[38].mxu0  ;;  %v2868_v3 = vld [vmem:[%s3058_s10 + $0x30] sm:$0xff] }
 0x32c   :  { %v2195_v39 = vpop.eup %2194  ;;  %v1408_v40 = vadd.f32 %v1407_v31, %v1406_v7  ;;  %v1298_v41 = vsub.f32 1.0, %v2193_v32  ;;  %2208 = vpow2.f32 %v1681_v2  ;;  %v2832_v45 = vpop.f32.mrb[44].mxu1  ;;  %v1683_v50 = vmul.f32 -1.442695, %v763_v5 }
 0x32d   :  { %v2197_v49 = vpop.eup %2196  ;;  %v1379_v46 = vmul.f32 %v2819_v44, %v1331_v33  ;;  %v1301_v17 = vsub.f32 1.0, %v2195_v39  ;;  %2210 = vrcp.f32 %v934_v36  ;;  %v2835_v51 = vpop.f32.mrb[39].mxu0  ;;  %v1185_v53 = vadd.f32 %v2733_v57, %v2659_v62 }
 0x32e   :  { %v2837_v16 = vpop.f32.mrb[45].mxu1  ;;  %v2840_v52 = vmul.f32 %v2764_v27, %v1298_v41  ;;  %2212 = vtanh.f32 %v1175_v24  ;;  %v773_v60 = vadd.f32 %v2782_v47, %v2652_v0  ;;  %v1682_v2 = vmul.f32 -1.442695, %v758_v42 }
 0x32f   :  { %v2199_v56 = vpop.eup %2198  ;;  %v1409_v58 = vsel %vm1386_vm4, %v1379_v46, 0.0  ;;  %v1333_v59 = vmul.f32 %v2183_v21, %v1301_v17  ;;  %2214 = vpow2.f32 %v1680_v30  ;;  %v2852_v5 = vpop.f32.mrb[40].mxu0  ;;  %v1180_v8 = vadd.f32 %v2659_v62, %v2737_v63 }
 0x330   :  { %v2201_v61 = vpop.eup %2200  ;;  %v1410_v27 = vadd.f32 %v1409_v58, %v1408_v40  ;;  %v937_v1 = vadd.f32 1.0, %v2199_v56  ;;  %2216 = vtanh.f32 %v1170_v12  ;;  %v2854_v6 = vpop.f32.mrb[46].mxu1  ;;  %v768_v47 = vadd.f32 %v2652_v0, %v2787_v54 }
 0x331   :  { %v1381_v7 = vmul.f32 %v2845_v25, %v1333_v59  ;;  %v1300_v57 = vsub.f32 1.0, %v2201_v61  ;;  %2218 = vpow2.f32 %v1683_v50  ;;  %v2859_v21 = vpop.f32.mrb[41].mxu0  ;;  %v2861_v11 = vpop.f32.mrb[47].mxu1  ;;  %v1685_v63 = vmul.f32 -1.442695, %v773_v60 }
 0x332   :  { %2220 = vrcp.f32 %v937_v1  ;;  %v2203_v34 = vpop.eup %2202  ;;  %v1195_v31 = vadd.f32 %v2757_v19, %v2659_v62  ;;  %v1376_v46 = vmul.f32 %v2868_v3, %v2803_v10  ;;  %v2890_v19 = vld [vmem:[%s3058_s10 + $0x68] sm:$0xff]  ;;  %v1684_v17 = vmul.f32 -1.442695, %v768_v47 }
 0x333   :  { %v1411_v23 = vsel %vm1386_vm4, %v1381_v7, 0.0  ;;  %v2871_v24 = vmul.f32 %v2189_v22, %v1300_v57  ;;  %2222 = vtanh.f32 %v1185_v53  ;;  %v936_v32 = vadd.f32 1.0, %v2203_v34  ;;  %v2875_v54 = vpop.f32.mrb[42].mxu0  ;;  %v2877_v33 = vpop.f32.mrb[48].mxu1  ;;  %v2909_v34 = vld [vmem:[%s3058_s10 + $0x40] sm:$0xff] }
 0x334   :  { %v2205_v12 = vpop.eup %2204  ;;  %v1412_v30 = vadd.f32 %v1411_v23, %v1410_v27  ;;  %2224 = vpow2.f32 %v1682_v2  ;;  %v783_v22 = vadd.f32 %v2805_v13, %v2652_v0  ;;  %v2881_v40 = vpop.f32.mrb[43].mxu0  ;;  %v1190_v13 = vadd.f32 %v2659_v62, %v2762_v26 }
 0x335   :  { %v2207_v36 = vpop.eup %2206  ;;  %v1303_v39 = vsub.f32 1.0, %v2205_v12  ;;  %2226 = vtanh.f32 %v1180_v8  ;;  %v2883_v41 = vpop.f32.mrb[49].mxu1  ;;  %v778_v10 = vadd.f32 %v2652_v0, %v2812_v18  ;;  %v1392_v26 = vsel %vm1386_vm4, %v1376_v46, 0.0 }
 0x336   :  { %v2209_v42 = vpop.eup %2208  ;;  %2228 = vrcp.f32 %v936_v32  ;;  %v1687_v1 = vmul.f32 -1.442695, %v783_v22  ;;  %v793_v12 = vadd.f32 %v2830_v43, %v2652_v0 }
 0x337   :  { %v2211_v50 = vpop.eup %2210  ;;  %v1335_v53 = vmul.f32 %v2197_v49, %v1303_v39  ;;  %v939_v56 = vadd.f32 1.0, %v2209_v42  ;;  %2230 = vpow2.f32 %v1685_v63  ;;  %v2896_v60 = vpop.f32.mrb[44].mxu0  ;;  %v1205_v63 = vadd.f32 %v2784_v48, %v2659_v62  ;;  %v2919_v42 = vld [vmem:[%s3058_s10 + $0x50] sm:$0xff] }
 0x338   :  { %v2213_v58 = vpop.eup %2212  ;;  %v1302_v59 = vsub.f32 1.0, %v2211_v50  ;;  %2232 = vtanh.f32 %v1195_v31  ;;  %v2899_v2 = vpop.f32.mrb[50].mxu1  ;;  %v1686_v39 = vmul.f32 -1.442695, %v778_v10  ;;  %v788_v48 = vadd.f32 %v2652_v0, %v2835_v51  ;;  %v2930_v50 = vld [vmem:[%s3058_s10 + $0x78] sm:$0xff] }
 0x339   :  { %v2215_v61 = vpop.eup %2214  ;;  %v1383_v27 = vmul.f32 %v2890_v19, %v1335_v53  ;;  %2234 = vrcp.f32 %v939_v56  ;;  %v2901_v49 = vpop.f32.mrb[45].mxu0  ;;  %v1215_v53 = vadd.f32 %v2807_v14, %v2659_v62  ;;  %v1689_v51 = vmul.f32 -1.442695, %v793_v12  ;;  %v2947_v14 = vld [vmem:[%s3058_s10 + $0x60] sm:$0xff] }
 0x33a   :  { %v2217_v7 = vpop.eup %2216  ;;  %v1334_v57 = vmul.f32 %v2207_v36, %v1302_v59  ;;  %v938_v8 = vadd.f32 1.0, %v2215_v61  ;;  %2236 = vpow2.f32 %v1684_v17  ;;  %v2904_v47 = vpop.f32.mrb[51].mxu1  ;;  %v1200_v17 = vadd.f32 %v2659_v62, %v2789_v55 }
 0x33b   :  { %v2219_v18 = vpop.eup %2218  ;;  %v1413_v23 = vsel %vm1386_vm4, %v1383_v27, 0.0  ;;  %2238 = vtanh.f32 %v1190_v13  ;;  %v803_v55 = vadd.f32 %v2852_v5, %v2652_v0  ;;  %v1210_v61 = vadd.f32 %v2659_v62, %v2814_v20 }
 0x33c   :  { %v2221_v32 = vpop.eup %2220  ;;  %v1414_v31 = vadd.f32 %v1413_v23, %v1412_v30  ;;  %2240 = vrcp.f32 %v938_v8  ;;  %v941_v36 = vadd.f32 1.0, %v2219_v18  ;;  %v1378_v30 = vmul.f32 %v2909_v34, %v2840_v52 }
 0x33d   :  { %v2223_v22 = vpop.eup %2222  ;;  %v1305_v46 = vsub.f32 1.0, %v2221_v32  ;;  %2242 = vpow2.f32 %v1687_v1  ;;  %v1380_v52 = vmul.f32 %v2919_v42, %v2871_v24  ;;  %v2942_v27 = vadd.f32 %v2832_v45, %v2659_v62  ;;  %v2955_v45 = vld [vmem:[%s3058_s10 + $0x70] sm:$0xff] }
 0x33e   :  { %v2225_v43 = vpop.eup %2224  ;;  %2244 = vrcp.f32 %v941_v36  ;;  %v1688_v8 = vmul.f32 -1.442695, %v788_v48  ;;  %v1691_v23 = vmul.f32 -1.442695, %v803_v55  ;;  %v798_v20 = vadd.f32 %v2652_v0, %v2859_v21 }
 0x33f   :  { %v2227_v56 = vpop.eup %2226  ;;  %v1337_v13 = vmul.f32 %v2213_v58, %v1305_v46  ;;  %v940_v59 = vadd.f32 1.0, %v2225_v43  ;;  %2246 = vtanh.f32 %v1205_v63  ;;  %v1382_v36 = vmul.f32 %v2947_v14, %v1334_v57 }
 0x340   :  { %v2229_v10 = vpop.eup %2228  ;;  %2248 = vpow2.f32 %v1686_v39  ;;  %v1393_v48 = vadd.f32 %v1392_v26, %v2809_v15  ;;  %v813_v55 = vadd.f32 %v2875_v54, %v2652_v0  ;;  %v808_v54 = vadd.f32 %v2652_v0, %v2881_v40 }
 0x341   :  { %v2231_v5 = vpop.eup %2230  ;;  %v1385_v58 = vmul.f32 %v2930_v50, %v1337_v13  ;;  %v1304_v1 = vsub.f32 1.0, %v2229_v10  ;;  %2250 = vrcp.f32 %v940_v59  ;;  %v1394_v59 = vsel %vm1386_vm4, %v1378_v30, 0.0 }
 0x342   :  { %v2233_v24 = vpop.eup %2232  ;;  %v943_v18 = vadd.f32 1.0, %v2231_v5  ;;  %2252 = vtanh.f32 %v1200_v17  ;;  %v1395_v57 = vadd.f32 %v1394_v59, %v1393_v48  ;;  %v1398_v15 = vsel %vm1386_vm4, %v1382_v36, 0.0 }
 0x343   :  { %v2235_v63 = vpop.eup %2234  ;;  %v1415_v12 = vsel %vm1386_vm4, %v1385_v58, 0.0  ;;  %v1336_v32 = vmul.f32 %v2217_v7, %v1304_v1  ;;  %2254 = vpow2.f32 %v1689_v51  ;;  %v1690_v58 = vmul.f32 -1.442695, %v798_v20 }
 0x344   :  { %v2237_v39 = vpop.eup %2236  ;;  %v2959_v46 = vadd.f32 %v1415_v12, %v1414_v31  ;;  %v1307_v17 = vsub.f32 1.0, %v2235_v63  ;;  %2256 = vrcp.f32 %v943_v18  ;;  %v1396_v31 = vsel %vm1386_vm4, %v1380_v52, 0.0 }
 0x345   :  { %v2239_v21 = vpop.eup %2238  ;;  %v942_v43 = vadd.f32 1.0, %v2237_v39  ;;  %v1384_v13 = vmul.f32 %v2955_v45, %v1336_v32  ;;  %2258 = vpow2.f32 %v1688_v8  ;;  %v1397_v18 = vadd.f32 %v1396_v31, %v1395_v57 }
 0x346   :  { %v2241_v7 = vpop.eup %2240  ;;  %v1339_v51 = vmul.f32 %v2223_v22, %v1307_v17  ;;  %v1220_v20 = vadd.f32 %v2659_v62, %v2837_v16  ;;  %v1693_v12 = vmul.f32 -1.442695, %v813_v55  ;;  %v1692_v16 = vmul.f32 -1.442695, %v808_v54 }
 0x347   :  { %v2243_v10 = vpop.eup %2242  ;;  %v1306_v5 = vsub.f32 1.0, %v2241_v7  ;;  %2260 = vrcp.f32 %v942_v43  ;;  %v1400_v8 = vsel %vm1386_vm4, %v1384_v13, 0.0  ;;  %v1399_v32 = vadd.f32 %v1398_v15, %v1397_v18 }
 0x348   :  { %v2245_v26 = vpop.eup %2244  ;;  %v945_v1 = vadd.f32 1.0, %v2243_v10  ;;  %2262 = vtanh.f32 %v1215_v53  ;;  %v1418_v53 = vmul.f32 %v2711_v35, %v1339_v51  ;;  %v1464_v55 = vmax.f32 %v2959_v46, 0.0 }
 0x349   :  { %v2247_v30 = vpop.eup %2246  ;;  %v1338_v63 = vmul.f32 %v2227_v56, %v1306_v5  ;;  %v1309_v22 = vsub.f32 1.0, %v2245_v26  ;;  %2264 = vpow2.f32 %v1691_v23  ;;  %v823_v56 = vadd.f32 %v2896_v60, %v2652_v0 }
 0x34a   :  { %v2249_v52 = vpop.eup %2248  ;;  %2266 = vrcp.f32 %v945_v1  ;;  %v1401_v23 = vadd.f32 %v1400_v8, %v1399_v32  ;;  %v1448_v51 = vsel %vm1386_vm4, %v1418_v53, 0.0  ;;  %v818_v46 = vadd.f32 %v2652_v0, %v2901_v49 }
 0x34b   :  { %v2251_v36 = vpop.eup %2250  ;;  %v1341_v39 = vmul.f32 %v2233_v24, %v1309_v22  ;;  %v944_v17 = vadd.f32 1.0, %v2249_v52  ;;  %2268 = vtanh.f32 %v1210_v61  ;;  %v1417_v35 = vmul.f32 %v2716_v37, %v1338_v63 }
 0x34c   :  { %v2253_v40 = vpop.eup %2252  ;;  %v1308_v48 = vsub.f32 1.0, %v2251_v36  ;;  %2270 = vpow2.f32 %v1690_v58  ;;  %v1463_v61 = vmax.f32 %v1401_v23, 0.0  ;;  %v1695_v58 = vmul.f32 -1.442695, %v823_v56 }
 0x34d   :  { %v2255_v43 = vpop.eup %2254  ;;  %v1420_v13 = vmul.f32 %v2743_v4, %v1341_v39  ;;  %2272 = vrcp.f32 %v944_v17  ;;  %v1433_v26 = vsel %vm1386_vm4, %v1417_v35, 0.0  ;;  %v1235_v49 = vadd.f32 %v2854_v6, %v2659_v62 }
 0x34e   :  { %v2257_v59 = vpop.eup %2256  ;;  %v1340_v24 = vmul.f32 %v2239_v21, %v1308_v48  ;;  %v947_v7 = vadd.f32 1.0, %v2255_v43  ;;  %2274 = vpow2.f32 %v1693_v12  ;;  %2052 = vmatprep.mubr.msk.f32.mxu0 %vm1386_vm4, %v1463_v61  ;;  %v1694_v22 = vmul.f32 -1.442695, %v818_v46 }
 0x34f   :  { %v1449_v57 = vsel %vm1386_vm4, %v1420_v13, 0.0  ;;  %v1311_v31 = vsub.f32 1.0, %v2257_v59  ;;  %v2259_v60 = vpop.eup %2258  ;;  %2053 = vmatmul.mubr.msk.f32.vlgmr.msra.gmra.mrb[46].mxu0 %vm1386_vm4, %v1464_v55  ;;  %v1230_v6 = vadd.f32 %v2659_v62, %v2861_v11 }
 0x350   :  { %v1450_v10 = vadd.f32 %v1449_v57, %v1448_v51  ;;  %v1419_v4 = vmul.f32 %v2750_v9, %v1340_v24  ;;  %2276 = vrcp.f32 %v947_v7  ;;  %v946_v5 = vadd.f32 1.0, %v2259_v60 }
 0x351   :  { %v2261_v37 = vpop.eup %2260  ;;  %v1343_v21 = vmul.f32 %v2247_v30, %v1311_v31  ;;  %2278 = vtanh.f32 %v2942_v27  ;;  %v1240_v57 = vadd.f32 %v2659_v62, %v2883_v41 }
 0x352   :  { %v2263_v15 = vpop.eup %2262  ;;  %v1434_v1 = vsel %vm1386_vm4, %v1419_v4, 0.0  ;;  %v1310_v9 = vsub.f32 1.0, %v2261_v37  ;;  %2280 = vpow2.f32 %v1692_v16  ;;  %v1245_v16 = vadd.f32 %v2877_v33, %v2659_v62 }
 0x353   :  { %v2265_v54 = vpop.eup %2264  ;;  %v1435_v18 = vadd.f32 %v1434_v1, %v1433_v26  ;;  %v1422_v0 = vmul.f32 %v2770_v29, %v1343_v21  ;;  %2282 = vrcp.f32 %v946_v5  ;;  %v1255_v5 = vadd.f32 %v2899_v2, %v2659_v62 }
 0x354   :  { %v2267_v27 = vpop.eup %2266  ;;  %v1342_v30 = vmul.f32 %v2253_v40, %v1310_v9  ;;  %2284 = vtanh.f32 %v1220_v20  ;;  %v949_v63 = vadd.f32 1.0, %v2265_v54 }
 0x355   :  { %v2269_v8 = vpop.eup %2268  ;;  %v1451_v52 = vsel %vm1386_vm4, %v1422_v0, 0.0  ;;  %v1313_v12 = vsub.f32 1.0, %v2267_v27  ;;  %2286 = vpow2.f32 %v1695_v58  ;;  %v2314_v0 = vld [vmem:[%s3055_s7] ss:$0 sm:$0xff] }
 0x356   :  { %v2271_v32 = vpop.eup %2270  ;;  %v1452_v36 = vadd.f32 %v1451_v52, %v1450_v10  ;;  %v1421_v53 = vmul.f32 %v2777_v38, %v1342_v30  ;;  %2288 = vrcp.f32 %v949_v63 }
 0x357   :  { %v2273_v29 = vpop.eup %2272  ;;  %v1345_v39 = vmul.f32 %v2263_v15, %v1313_v12  ;;  %2290 = vtanh.f32 %v1235_v49  ;;  %v948_v17 = vadd.f32 1.0, %v2271_v32  ;;  %v1250_v49 = vadd.f32 %v2314_v0, %v2904_v47 }
 0x358   :  { %v1436_v20 = vsel %vm1386_vm4, %v1421_v53, 0.0  ;;  %v1312_v40 = vsub.f32 1.0, %v2273_v29  ;;  %2292 = vpow2.f32 %v1694_v22  ;;  %v2275_v48 = vpop.eup %2274 }
 0x359   :  { %v1437_v56 = vadd.f32 %v1436_v20, %v1435_v18  ;;  %v1424_v23 = vmul.f32 %v2795_v28, %v1345_v39  ;;  %2294 = vrcp.f32 %v948_v17  ;;  %v951_v38 = vadd.f32 1.0, %v2275_v48 }
 0x35a   :  { %v2277_v43 = vpop.eup %2276  ;;  %v1344_v13 = vmul.f32 %v2269_v8, %v1312_v40  ;;  %2296 = vtanh.f32 %v1230_v6 }
 0x35b   :  { %v2279_v55 = vpop.eup %2278  ;;  %v1453_v59 = vsel %vm1386_vm4, %v1424_v23, 0.0  ;;  %v1315_v35 = vsub.f32 1.0, %v2277_v43  ;;  %2298 = vrcp.f32 %v951_v38 }
 0x35c   :  { %v2281_v11 = vpop.eup %2280  ;;  %v1423_v24 = vmul.f32 %v2868_v3, %v1344_v13  ;;  %v1454_v7 = vadd.f32 %v1453_v59, %v1452_v36  ;;  %2300 = vtanh.f32 %v1245_v16 }
 0x35d   :  { %v2283_v61 = vpop.eup %2282  ;;  %v1347_v51 = vmul.f32 %v2279_v55, %v1315_v35  ;;  %v950_v28 = vadd.f32 1.0, %v2281_v11 }
 0x35e   :  { %v2285_v31 = vpop.eup %2284  ;;  %v1438_v60 = vsel %vm1386_vm4, %v1423_v24, 0.0  ;;  %v1314_v33 = vsub.f32 1.0, %v2283_v61 }
 0x35f   :  { %v2287_v10 = vpop.eup %2286  ;;  %v1426_v4 = vmul.f32 %v2819_v44, %v1347_v51  ;;  %2302 = vrcp.f32 %v950_v28  ;;  %v1439_v46 = vadd.f32 %v1438_v60, %v1437_v56 }
 0x360   :  { %v2289_v37 = vpop.eup %2288  ;;  %v1346_v3 = vmul.f32 %v2285_v31, %v1314_v33  ;;  %v953_v21 = vadd.f32 1.0, %v2287_v10  ;;  %2304 = vtanh.f32 %v1240_v57  ;;  %v1729_v31 = vld [vmem:[%s3057_s9] ss:$0 sm:$0xff]  ;;  %s2315_s9 = scalar_lea.vmem %s1585_s24, 512 }
 0x361   :  { %v2291_v58 = vpop.eup %2290  ;;  %v1317_v15 = vsub.f32 1.0, %v2289_v37  ;;  %v1455_v41 = vsel %vm1386_vm4, %v1426_v4, 0.0  ;;  %p2316_p0 = scmp.ne.s32.totalorder %s1585_s24, %s2315_s9  ;;  %p2321_p2 = scmp.lt.s32.totalorder %s2315_s9, %s2315_s9 }
 0x362   :  { %v2293_v26 = vpop.eup %2292  ;;  %v1425_v1 = vmul.f32 %v2909_v34, %v1346_v3  ;;  %2306 = vrcp.f32 %v953_v21  ;;  %v1456_v9 = vadd.f32 %v1455_v41, %v1454_v7 }
 0x363   :  { %v2295_v54 = vpop.eup %2294  ;;  %v1349_v44 = vmul.f32 %v2291_v58, %v1317_v15  ;;  %v952_v18 = vadd.f32 1.0, %v2293_v26  ;;  %2308 = vtanh.f32 %v1255_v5  ;;  %p2322_p3 = por %p2321_p2, %p2320_p1 }
 0x364   :  { %v1316_v62 = vsub.f32 1.0, %v2295_v54  ;;  %v1440_v2 = vsel %vm1386_vm4, %v1425_v1, 0.0  ;;  %v2297_v27 = vpop.eup %2296 }
 0x365   :  { %v1428_v30 = vmul.f32 %v2845_v25, %v1349_v44  ;;  %2310 = vrcp.f32 %v952_v18  ;;  %v1441_v34 = vadd.f32 %v1440_v2, %v1439_v46  ;;  %v2299_v63 = vpop.eup %2298  ;;  %p2323_p4 = pnand %p2322_p3, %p2316_p0 }
 0x366   :  { %v1348_v22 = vmul.f32 %v2297_v27, %v1316_v62  ;;  %v1319_v8 = vsub.f32 1.0, %v2299_v63  ;;  %2312 = vtanh.f32 %v1250_v49  ;;  %v2301_v12 = vpop.eup %2300 }
 0x367   :  { %v1457_v52 = vsel %vm1386_vm4, %v1428_v30, 0.0 }
 0x368   :  { %v1427_v32 = vmul.f32 %v2919_v42, %v1348_v22  ;;  %v1458_v36 = vadd.f32 %v1457_v52, %v1456_v9  ;;  %v1351_v53 = vmul.f32 %v2301_v12, %v1319_v8 }
 0x369   :  { %v2303_v47 = vpop.eup %2302 }
 0x36a   :  { %v1318_v29 = vsub.f32 1.0, %v2303_v47  ;;  %v1442_v39 = vsel %vm1386_vm4, %v1427_v32, 0.0  ;;  %v2305_v17 = vpop.eup %2304  ;;  %v1430_v25 = vmul.f32 %v2890_v19, %v1351_v53 }
 0x36b   :  { %v1443_v6 = vadd.f32 %v1442_v39, %v1441_v34 }
 0x36c   :  { %v2307_v20 = vpop.eup %2306  ;;  %v1350_v40 = vmul.f32 %v2305_v17, %v1318_v29  ;;  %v1459_v56 = vsel %vm1386_vm4, %v1430_v25, 0.0 }
 0x36d   :  { %v1321_v48 = vsub.f32 1.0, %v2307_v20  ;;  %v2309_v23 = vpop.eup %2308  ;;  %v1460_v13 = vadd.f32 %v1459_v56, %v1458_v36 }
 0x36e   :  { %v1429_v43 = vmul.f32 %v2947_v14, %v1350_v40 }
 0x36f   :  { %v2311_v42 = vpop.eup %2310  ;;  %v1353_v38 = vmul.f32 %v2309_v23, %v1321_v48 }
 0x370   :  { %v1320_v16 = vsub.f32 1.0, %v2311_v42  ;;  %v1444_v55 = vsel %vm1386_vm4, %v1429_v43, 0.0  ;;  %v2313_v59 = vpop.eup %2312 }
 0x371   :  { %v1445_v35 = vadd.f32 %v1444_v55, %v1443_v6  ;;  %v1432_v11 = vmul.f32 %v2930_v50, %v1353_v38 }
 0x372   :  { %v1352_v24 = vmul.f32 %v2313_v59, %v1320_v16 }
 0x373   :  { %v1461_v19 = vsel %vm1386_vm4, %v1432_v11, 0.0 }
 0x374   :  { %v1431_v7 = vmul.f32 %v2955_v45, %v1352_v24  ;;  %v1462_v61 = vadd.f32 %v1461_v19, %v1460_v13 }
 0x376   :  { %v1446_v51 = vsel %vm1386_vm4, %v1431_v7, 0.0  ;;  %v1466_v57 = vmax.f32 %v1462_v61, 0.0 }
 0x377   :  { %v1447_v28 = vadd.f32 %v1446_v51, %v1445_v35 }
 0x379   :  { %v1465_v14 = vmax.f32 %v1447_v28, 0.0 }
 0x37b   :  { %2055 = vmatprep.mubr.msk.f32.mxu0 %vm1386_vm4, %v1465_v14 }
 0x37c   :  { %2056 = vmatmul.mubr.msk.f32.gmra.mrb[48].mxu0 %vm1386_vm4, %v1466_v57 }
 0x422   :  { %v2054_v50 = vpop.f32.mrb[46].mxu0 }
 0x423   :  { %v1562_v60 = vadd.f32 %v2054_v50, %v1729_v31  ;;  %v1556_v33 = vpop.f32.mrb[47].mxu0 }
 0x424   :  { %v1557_v10 = vadd.f32 %v1729_v31, %v1556_v33 }
 0x425   :  { %1576 = vst.msk [vmem:[#allocation2 + $0x8] sm:$0xff] %vm1386_vm4, %v1562_v60 }
 0x426   :  { %1575 = vst.msk [vmem:[#allocation2] sm:$0xff] %vm1386_vm4, %v1557_v10 }
 0x44f   :  { %v2057_v45 = vpop.f32.mrb[48].mxu0 }
 0x450   :  { %v1572_v4 = vadd.f32 %v2057_v45, %v1729_v31  ;;  %v1566_v46 = vpop.f32.mrb[49].mxu0 }
 0x451   :  { %v1567_v37 = vadd.f32 %v1729_v31, %v1566_v46 }
 0x452   :  { %1578 = vst.msk [vmem:[#allocation2 + $0x18] sm:$0xff] %vm1386_vm4, %v1572_v4 }
 0x453   :  { %1577 = vst.msk [vmem:[#allocation2 + $0x10] sm:$0xff] %vm1386_vm4, %v1567_v37 }
 0x454   :  { %2326 = shalt.err (!%p2323_p4)
}
 0x455   :  { %s2327_s0 = scalar_lea.hbm %s3059_s11, 512 }
 0x456   :  { %p2328_p5 = scmp.ne.s32.totalorder %s3059_s11, %s2327_s0  ;;  %p2331_p6 = scmp.lt.u32.totalorder %s2327_s0, %s3059_s11 }
 0x458   :  { %p2333_p7 = pnand %p2331_p6, %p2328_p5 }
 0x45a   :  { %2336 = shalt.err (!%p2333_p7)
}
 0x45b   :  { %s2355_s2 = smov 128   ;;  %s2356_s28 = smov 8  }
 0x45c   :  { %1590 = dma.vmem_to_hbm [thread:$0]  %s1585_s24, 512, %s3059_s11, [#allocation3], %s2355_s2, %s2355_s2, %s2356_s28  }
 0x45d   :  { %2337 = dma.done.wait [#allocation3], 512  }
 0x45e   :  { %2338 = vsyncadd [#allocation3], 4294966784 }
 0x45f   :  { %1594 = vsyncpa [#allocation3], 1 }

</bundles_post_ra>
